<compile_context>
chip_gen: v6e
topology: v6e:2x2x1
jax: 0.10.0
libtpu: 0.0.40
codegen_flags: <defaults>
</compile_context>

<pallas_src>
import jax
import jax.numpy as jnp
from jax import lax
from jax.experimental import pallas as pl
from jax.experimental.pallas import tpu as pltpu

T_HOURS = 24
K_BLOCK = 5        # hidden Conv1d kernel size (padding=2)
K_LAST = 3         # final Conv1d kernel size (padding=1)
PAD_BLOCK = 2
PAD_LAST = 1
LANE = 128         # TPU lane width; each conv tap's channels live in a
                   # 128-lane slot of the im2col scratch (aligned slices).
DATA_OFF = 8       # activations occupy rows [DATA_OFF, DATA_OFF+T) of the
                   # padded scratch (sublane-aligned store offset).


# ------------------------------- fused kernel -------------------------------

def make_fused_kernel(nb_layer, batch, t_len):
    B, T = batch, t_len
    tap0_hid = DATA_OFF - PAD_BLOCK    # scratch row of tap 0 for the k=5 convs
    tap0_last = DATA_OFF - PAD_LAST    # scratch row of tap 0 for the k=3 conv

    def kernel(*refs):
        # refs = [x, (w_l, shift_l)*nb_layer, last_w, last_b, out, pad, cols]
        x_ref = refs[0]
        layer_refs = refs[1:1 + 2 * nb_layer]
        lw_ref = refs[1 + 2 * nb_layer]      # (K_LAST, C_hid)
        lb_ref = refs[2 + 2 * nb_layer]      # (1, 1)
        out_ref = refs[3 + 2 * nb_layer]     # (B, T)
        pad_ref = refs[4 + 2 * nb_layer]     # (B, DATA_OFF+T+2, C_max) scratch
        cols_ref = refs[5 + 2 * nb_layer]    # (B*T, K_BLOCK*LANE) scratch

        # Zero both scratches once: pad_ref's halo rows stay zero for every
        # layer (that is the conv zero-padding) and cols_ref's unused lanes
        # stay zero so the embedded im2col matmul is exact.
        pad_ref[...] = jnp.zeros(pad_ref.shape, jnp.float32)
        cols_ref[...] = jnp.zeros(cols_ref.shape, jnp.float32)

        # Stage the network input (channels-last) into the padded scratch.
        c_in = x_ref.shape[-1]
        pad_ref[:, DATA_OFF:DATA_OFF + T, :c_in] = x_ref[...]

        # Hidden blocks: Conv1d(k=5, p=2) + folded BatchNorm + ReLU.
        # One MXU matmul per layer; activations never leave VMEM.
        for layer in range(nb_layer):
            w_ref = layer_refs[2 * layer]          # (K_BLOCK*LANE, C_out)
            shift_ref = layer_refs[2 * layer + 1]  # (1, C_out)
            c_out = w_ref.shape[-1]

            # im2col staging copies (static, tiny): tap k -> lane slot k*LANE.
            for b in range(B):
                for k in range(K_BLOCK):
                    cols_ref[b * T:(b + 1) * T, k * LANE:k * LANE + c_in] = (
                        pad_ref[b, tap0_hid + k:tap0_hid + k + T, :c_in])

            acc = jnp.dot(cols_ref[...], w_ref[...],
                          preferred_element_type=jnp.float32)   # (B*T, C_out)
            act = jnp.maximum(acc + shift_ref[...], 0.0)

            for b in range(B):
                pad_ref[b, DATA_OFF:DATA_OFF + T, :c_out] = (
                    act[b * T:(b + 1) * T, :])
            c_in = c_out

        # Final Conv1d(k=3, p=1, C_out=1) + 5*sigmoid + hour mask on the
        # VPU/XLU (a width-1 matmul would waste 127/128 MXU output lanes);
        # output is a lane-dense (B, T) slab.
        c_hid = lw_ref.shape[-1]
        w_last = lw_ref[...]                                  # (K_LAST, C_hid)
        acc = jnp.zeros((B, T), jnp.float32) + lb_ref[...]    # bias broadcast
        for k in range(K_LAST):
            xk = pad_ref[:, tap0_last + k:tap0_last + k + T, :c_hid]  # (B,T,C)
            acc = acc + jnp.sum(xk * w_last[k][None, None, :], axis=-1)

        t_idx = lax.broadcasted_iota(jnp.int32, (B, T), 1)
        mask = ((t_idx >= 6) & (t_idx < 21)).astype(jnp.float32)  # hours 6..20
        out_ref[...] = 5.0 * jax.nn.sigmoid(acc) * mask

    return kernel


def fused_convnet(x, params):
    """x: (B, T, C_in) channels-last float32 -> (B, T) masked predictions."""
    B, T, c_in0 = x.shape
    blocks = params["blocks"]
    nb_layer = len(blocks)
    c_hid = blocks[0][0].shape[-1]
    c_max = max(c_in0, c_hid)

    inputs = [x]
    for w, shift in blocks:
        inputs.extend([w, shift])
    inputs.extend([params["last_w"], params["last_b"]])

    return pl.pallas_call(
        make_fused_kernel(nb_layer, B, T),
        out_shape=jax.ShapeDtypeStruct((B, T), jnp.float32),
        in_specs=[pl.BlockSpec(memory_space=pltpu.MemorySpace.VMEM)
                  for _ in inputs],
        out_specs=pl.BlockSpec(memory_space=pltpu.MemorySpace.VMEM),
        scratch_shapes=[
            pltpu.VMEM((B, DATA_OFF + T + PAD_BLOCK, c_max), jnp.float32),
            pltpu.VMEM((B * T, K_BLOCK * LANE), jnp.float32),
        ],
        # TODO(synk): at realistic batch sizes add a batch grid with
        # dimension_semantics=("parallel",) so v7x's two TensorCores split the
        # work; at B=2 a grid-less single call has the lowest overhead.
    )(*inputs)


# --------------------------- parameter creation ------------------------------

def init_params(key, nb_input_features, nb_hidden_features, nb_layer):
    """PyTorch-style init (uniform +-1/sqrt(C_in*K)); BN folded in eval mode."""
    eps = 1e-5
    blocks = []
    c_in = nb_input_features
    for _ in range(nb_layer):
        key, kw, kb = jax.random.split(key, 3)
        bound = 1.0 / jnp.sqrt(c_in * K_BLOCK)
        w = jax.random.uniform(kw, (nb_hidden_features, c_in, K_BLOCK),
                               jnp.float32, -bound, bound)   # torch (Cout,Cin,K)
        b = jax.random.uniform(kb, (nb_hidden_features,), jnp.float32,
                               -bound, bound)
        # fresh BatchNorm1d: gamma=1, beta=0, running_mean=0, running_var=1
        # TODO(synk): training-mode batch statistics not implemented; BN is
        # applied in eval mode and folded into the conv weights + shift.
        gamma = jnp.ones((nb_hidden_features,), jnp.float32)
        beta = jnp.zeros((nb_hidden_features,), jnp.float32)
        mean = jnp.zeros((nb_hidden_features,), jnp.float32)
        var = jnp.ones((nb_hidden_features,), jnp.float32)
        scale = gamma / jnp.sqrt(var + eps)
        shift = (b - mean) * scale + beta
        # Fold BN scale into the weights and embed each tap's C_in channels in
        # a 128-lane slot: (Cout,Cin,K) -> (K,Cin,Cout) -> (K*LANE, Cout).
        w_t = jnp.transpose(w, (2, 1, 0)) * scale[None, None, :]
        w_emb = jnp.zeros((K_BLOCK, LANE, nb_hidden_features), jnp.float32)
        w_emb = w_emb.at[:, :c_in, :].set(w_t)
        blocks.append((w_emb.reshape(K_BLOCK * LANE, nb_hidden_features),
                       shift[None, :]))
        c_in = nb_hidden_features

    key, kw, kb = jax.random.split(key, 3)
    bound = 1.0 / jnp.sqrt(nb_hidden_features * K_LAST)
    w_last = jax.random.uniform(kw, (1, nb_hidden_features, K_LAST),
                                jnp.float32, -bound, bound)
    b_last = jax.random.uniform(kb, (1,), jnp.float32, -bound, bound)
    return {
        "blocks": blocks,
        "last_w": jnp.transpose(w_last[0], (1, 0)),   # (K_LAST, C_hid)
        "last_b": b_last[None, :],                    # (1, 1)
    }


# ------------------------------ forward pass ---------------------------------

def convnet_forward(params, yr, doy, era5_main, era5_hourly, era5_daily):
    del era5_daily  # unused by the reference forward
    b = yr.shape[0]
    doy_ = jnp.tile(doy, (1, T_HOURS))[:, None, :]                 # (b, 1, 24)
    yr_ = jnp.tile(yr, (1, T_HOURS))[:, None, :]                   # (b, 1, 24)
    _, f, t, x = era5_hourly.shape
    era5_hourly_ = jnp.transpose(era5_hourly, (0, 1, 3, 2)).reshape(b, f * x, t)
    era5_main_ = jnp.squeeze(era5_main, axis=2)                    # keep batch dim
    X_h = jnp.concatenate([era5_main_, era5_hourly_, doy_, yr_], axis=1)

    # channels-last for the fused Pallas kernel
    h = jnp.transpose(X_h, (0, 2, 1)).astype(jnp.float32)          # (b, 24, C_in)
    out = fused_convnet(h, params)                                 # (b, 24)
    return out[:, None, :]                                         # (b, 1, 24)


# ----------------------------------- main ------------------------------------

if __name__ == "__main__":
    B = 2
    C_MAIN, F_HOURLY, X_HOURLY = 4, 3, 2
    NB_INPUT = C_MAIN + F_HOURLY * X_HOURLY + 2                    # 12
    NB_HIDDEN = 32
    NB_LAYER = 2

    key = jax.random.PRNGKey(0)
    key, k1, k2, k3, k4, k5, kp = jax.random.split(key, 7)
    yr = jax.random.uniform(k1, (B, 1), jnp.float32)
    doy = jax.random.uniform(k2, (B, 1), jnp.float32)
    era5_main = jax.random.normal(k3, (B, C_MAIN, 1, T_HOURS), jnp.float32)
    era5_hourly = jax.random.normal(k4, (B, F_HOURLY, T_HOURS, X_HOURLY),
                                    jnp.float32)
    era5_daily = jax.random.normal(k5, (B, 5), jnp.float32)        # unused

    params = init_params(kp, NB_INPUT, NB_HIDDEN, NB_LAYER)
    out = convnet_forward(params, yr, doy, era5_main, era5_hourly, era5_daily)
    out = jax.block_until_ready(out)
    assert out.shape == (B, 1, T_HOURS), out.shape
    print("KERNEL_OK")
</pallas_src>

<mosaic_0001>
module attributes {stable_mosaic.version = 11 : i64} {
  func.func @kernel(%arg0: memref<2x24x12xf32, #tpu.memory_space<vmem>>, %arg1: memref<640x32xf32, #tpu.memory_space<vmem>>, %arg2: memref<1x32xf32, #tpu.memory_space<vmem>>, %arg3: memref<640x32xf32, #tpu.memory_space<vmem>>, %arg4: memref<1x32xf32, #tpu.memory_space<vmem>>, %arg5: memref<3x32xf32, #tpu.memory_space<vmem>>, %arg6: memref<1x1xf32, #tpu.memory_space<vmem>>, %arg7: memref<2x24xf32, #tpu.memory_space<vmem>>, %arg8: memref<2x34x32xf32, #tpu.memory_space<vmem>>, %arg9: memref<48x640xf32, #tpu.memory_space<vmem>>) attributes {dimension_semantics = [], scalar_prefetch = 0 : i64, scratch_operands = 2 : i64, tpu.core_type = #tpu.core_type<tc>} {
    %cst = arith.constant 0.000000e+00 : f32
    %0 = vector.broadcast %cst : f32 to vector<2x34x32xf32>
    %c0 = arith.constant 0 : index
    %c0_0 = arith.constant 0 : index
    %c0_1 = arith.constant 0 : index
    %1 = vector.load %arg8[%c0, %c0_0, %c0_1] : memref<2x34x32xf32, #tpu.memory_space<vmem>>, vector<2x34x32xf32>
    tpu.vector_store %arg8[%c0, %c0_0, %c0_1], %0 {strides = array<i32>} : memref<2x34x32xf32, #tpu.memory_space<vmem>>, vector<2x34x32xf32>,
    %cst_2 = arith.constant 0.000000e+00 : f32
    %2 = vector.broadcast %cst_2 : f32 to vector<48x640xf32>
    %c0_3 = arith.constant 0 : index
    %c0_4 = arith.constant 0 : index
    %3 = vector.load %arg9[%c0_3, %c0_4] : memref<48x640xf32, #tpu.memory_space<vmem>>, vector<48x640xf32>
    tpu.vector_store %arg9[%c0_3, %c0_4], %2 {strides = array<i32>} : memref<48x640xf32, #tpu.memory_space<vmem>>, vector<48x640xf32>,
    %c0_5 = arith.constant 0 : index
    %c0_6 = arith.constant 0 : index
    %c0_7 = arith.constant 0 : index
    %4 = vector.load %arg0[%c0_5, %c0_6, %c0_7] : memref<2x24x12xf32, #tpu.memory_space<vmem>>, vector<2x24x12xf32>
    %c0_8 = arith.constant 0 : index
    %c8 = arith.constant 8 : index
    %c0_9 = arith.constant 0 : index
    %5 = vector.load %arg8[%c0_8, %c8, %c0_9] : memref<2x34x32xf32, #tpu.memory_space<vmem>>, vector<2x24x12xf32>
    tpu.vector_store %arg8[%c0_8, %c8, %c0_9], %4 {strides = array<i32>} : memref<2x34x32xf32, #tpu.memory_space<vmem>>, vector<2x24x12xf32>,
    %c0_10 = arith.constant 0 : index
    %c6 = arith.constant 6 : index
    %c0_11 = arith.constant 0 : index
    %6 = vector.load %arg8[%c0_10, %c6, %c0_11] : memref<2x34x32xf32, #tpu.memory_space<vmem>>, vector<1x24x12xf32>
    %7 = vector.shape_cast %6 : vector<1x24x12xf32> to vector<24x12xf32>
    %c0_12 = arith.constant 0 : index
    %c0_13 = arith.constant 0 : index
    %8 = vector.load %arg9[%c0_12, %c0_13] : memref<48x640xf32, #tpu.memory_space<vmem>>, vector<24x12xf32>
    tpu.vector_store %arg9[%c0_12, %c0_13], %7 {strides = array<i32>} : memref<48x640xf32, #tpu.memory_space<vmem>>, vector<24x12xf32>,
    %c0_14 = arith.constant 0 : index
    %c7 = arith.constant 7 : index
    %c0_15 = arith.constant 0 : index
    %9 = vector.load %arg8[%c0_14, %c7, %c0_15] : memref<2x34x32xf32, #tpu.memory_space<vmem>>, vector<1x24x12xf32>
    %10 = vector.shape_cast %9 : vector<1x24x12xf32> to vector<24x12xf32>
    %c0_16 = arith.constant 0 : index
    %c128 = arith.constant 128 : index
    %11 = vector.load %arg9[%c0_16, %c128] : memref<48x640xf32, #tpu.memory_space<vmem>>, vector<24x12xf32>
    tpu.vector_store %arg9[%c0_16, %c128], %10 {strides = array<i32>} : memref<48x640xf32, #tpu.memory_space<vmem>>, vector<24x12xf32>,
    %c0_17 = arith.constant 0 : index
    %c8_18 = arith.constant 8 : index
    %c0_19 = arith.constant 0 : index
    %12 = vector.load %arg8[%c0_17, %c8_18, %c0_19] : memref<2x34x32xf32, #tpu.memory_space<vmem>>, vector<1x24x12xf32>
    %13 = vector.shape_cast %12 : vector<1x24x12xf32> to vector<24x12xf32>
    %c0_20 = arith.constant 0 : index
    %c256 = arith.constant 256 : index
    %14 = vector.load %arg9[%c0_20, %c256] : memref<48x640xf32, #tpu.memory_space<vmem>>, vector<24x12xf32>
    tpu.vector_store %arg9[%c0_20, %c256], %13 {strides = array<i32>} : memref<48x640xf32, #tpu.memory_space<vmem>>, vector<24x12xf32>,
    %c0_21 = arith.constant 0 : index
    %c9 = arith.constant 9 : index
    %c0_22 = arith.constant 0 : index
    %15 = vector.load %arg8[%c0_21, %c9, %c0_22] : memref<2x34x32xf32, #tpu.memory_space<vmem>>, vector<1x24x12xf32>
    %16 = vector.shape_cast %15 : vector<1x24x12xf32> to vector<24x12xf32>
    %c0_23 = arith.constant 0 : index
    %c384 = arith.constant 384 : index
    %17 = vector.load %arg9[%c0_23, %c384] : memref<48x640xf32, #tpu.memory_space<vmem>>, vector<24x12xf32>
    tpu.vector_store %arg9[%c0_23, %c384], %16 {strides = array<i32>} : memref<48x640xf32, #tpu.memory_space<vmem>>, vector<24x12xf32>,
    %c0_24 = arith.constant 0 : index
    %c10 = arith.constant 10 : index
    %c0_25 = arith.constant 0 : index
    %18 = vector.load %arg8[%c0_24, %c10, %c0_25] : memref<2x34x32xf32, #tpu.memory_space<vmem>>, vector<1x24x12xf32>
    %19 = vector.shape_cast %18 : vector<1x24x12xf32> to vector<24x12xf32>
    %c0_26 = arith.constant 0 : index
    %c512 = arith.constant 512 : index
    %20 = vector.load %arg9[%c0_26, %c512] : memref<48x640xf32, #tpu.memory_space<vmem>>, vector<24x12xf32>
    tpu.vector_store %arg9[%c0_26, %c512], %19 {strides = array<i32>} : memref<48x640xf32, #tpu.memory_space<vmem>>, vector<24x12xf32>,
    %c1 = arith.constant 1 : index
    %c6_27 = arith.constant 6 : index
    %c0_28 = arith.constant 0 : index
    %21 = vector.load %arg8[%c1, %c6_27, %c0_28] : memref<2x34x32xf32, #tpu.memory_space<vmem>>, vector<1x24x12xf32>
    %22 = vector.shape_cast %21 : vector<1x24x12xf32> to vector<24x12xf32>
    %c24 = arith.constant 24 : index
    %c0_29 = arith.constant 0 : index
    %23 = vector.load %arg9[%c24, %c0_29] : memref<48x640xf32, #tpu.memory_space<vmem>>, vector<24x12xf32>
    tpu.vector_store %arg9[%c24, %c0_29], %22 {strides = array<i32>} : memref<48x640xf32, #tpu.memory_space<vmem>>, vector<24x12xf32>,
    %c1_30 = arith.constant 1 : index
    %c7_31 = arith.constant 7 : index
    %c0_32 = arith.constant 0 : index
    %24 = vector.load %arg8[%c1_30, %c7_31, %c0_32] : memref<2x34x32xf32, #tpu.memory_space<vmem>>, vector<1x24x12xf32>
    %25 = vector.shape_cast %24 : vector<1x24x12xf32> to vector<24x12xf32>
    %c24_33 = arith.constant 24 : index
    %c128_34 = arith.constant 128 : index
    %26 = vector.load %arg9[%c24_33, %c128_34] : memref<48x640xf32, #tpu.memory_space<vmem>>, vector<24x12xf32>
    tpu.vector_store %arg9[%c24_33, %c128_34], %25 {strides = array<i32>} : memref<48x640xf32, #tpu.memory_space<vmem>>, vector<24x12xf32>,
    %c1_35 = arith.constant 1 : index
    %c8_36 = arith.constant 8 : index
    %c0_37 = arith.constant 0 : index
    %27 = vector.load %arg8[%c1_35, %c8_36, %c0_37] : memref<2x34x32xf32, #tpu.memory_space<vmem>>, vector<1x24x12xf32>
    %28 = vector.shape_cast %27 : vector<1x24x12xf32> to vector<24x12xf32>
    %c24_38 = arith.constant 24 : index
    %c256_39 = arith.constant 256 : index
    %29 = vector.load %arg9[%c24_38, %c256_39] : memref<48x640xf32, #tpu.memory_space<vmem>>, vector<24x12xf32>
    tpu.vector_store %arg9[%c24_38, %c256_39], %28 {strides = array<i32>} : memref<48x640xf32, #tpu.memory_space<vmem>>, vector<24x12xf32>,
    %c1_40 = arith.constant 1 : index
    %c9_41 = arith.constant 9 : index
    %c0_42 = arith.constant 0 : index
    %30 = vector.load %arg8[%c1_40, %c9_41, %c0_42] : memref<2x34x32xf32, #tpu.memory_space<vmem>>, vector<1x24x12xf32>
    %31 = vector.shape_cast %30 : vector<1x24x12xf32> to vector<24x12xf32>
    %c24_43 = arith.constant 24 : index
    %c384_44 = arith.constant 384 : index
    %32 = vector.load %arg9[%c24_43, %c384_44] : memref<48x640xf32, #tpu.memory_space<vmem>>, vector<24x12xf32>
    tpu.vector_store %arg9[%c24_43, %c384_44], %31 {strides = array<i32>} : memref<48x640xf32, #tpu.memory_space<vmem>>, vector<24x12xf32>,
    %c1_45 = arith.constant 1 : index
    %c10_46 = arith.constant 10 : index
    %c0_47 = arith.constant 0 : index
    %33 = vector.load %arg8[%c1_45, %c10_46, %c0_47] : memref<2x34x32xf32, #tpu.memory_space<vmem>>, vector<1x24x12xf32>
    %34 = vector.shape_cast %33 : vector<1x24x12xf32> to vector<24x12xf32>
    %c24_48 = arith.constant 24 : index
    %c512_49 = arith.constant 512 : index
    %35 = vector.load %arg9[%c24_48, %c512_49] : memref<48x640xf32, #tpu.memory_space<vmem>>, vector<24x12xf32>
    tpu.vector_store %arg9[%c24_48, %c512_49], %34 {strides = array<i32>} : memref<48x640xf32, #tpu.memory_space<vmem>>, vector<24x12xf32>,
    %c0_50 = arith.constant 0 : index
    %c0_51 = arith.constant 0 : index
    %36 = vector.load %arg9[%c0_50, %c0_51] : memref<48x640xf32, #tpu.memory_space<vmem>>, vector<48x640xf32>
    %c0_52 = arith.constant 0 : index
    %c0_53 = arith.constant 0 : index
    %37 = vector.load %arg1[%c0_52, %c0_53] : memref<640x32xf32, #tpu.memory_space<vmem>>, vector<640x32xf32>
    %cst_54 = arith.constant dense<0.000000e+00> : vector<48x32xf32>
    %38 = tpu.matmul %36, %37, %cst_54 {dimension_numbers = #tpu.dot_dimension_numbers<[1], [0], [0], [1], [0, 0, 1, 1], [], []>} : vector<48x640xf32>, vector<640x32xf32>, vector<48x32xf32> -> vector<48x32xf32>
    %c0_55 = arith.constant 0 : index
    %c0_56 = arith.constant 0 : index
    %39 = vector.load %arg2[%c0_55, %c0_56] : memref<1x32xf32, #tpu.memory_space<vmem>>, vector<1x32xf32>
    %40 = vector.broadcast %39 : vector<1x32xf32> to vector<48x32xf32>
    %41 = arith.addf %38, %40 : vector<48x32xf32>
    %cst_57 = arith.constant 0.000000e+00 : f32
    %42 = vector.broadcast %cst_57 : f32 to vector<48x32xf32>
    %43 = arith.maximumf %41, %42 : vector<48x32xf32>
    %44 = vector.extract_strided_slice %43 {offsets = [0, 0], sizes = [24, 32], strides = [1, 1]} : vector<48x32xf32> to vector<24x32xf32>
    %c0_58 = arith.constant 0 : index
    %c8_59 = arith.constant 8 : index
    %c0_60 = arith.constant 0 : index
    %45 = vector.load %arg8[%c0_58, %c8_59, %c0_60] : memref<2x34x32xf32, #tpu.memory_space<vmem>>, vector<1x24x32xf32>
    %46 = vector.shape_cast %45 : vector<1x24x32xf32> to vector<24x32xf32>
    %47 = vector.shape_cast %44 : vector<24x32xf32> to vector<1x24x32xf32>
    tpu.vector_store %arg8[%c0_58, %c8_59, %c0_60], %47 {strides = array<i32>} : memref<2x34x32xf32, #tpu.memory_space<vmem>>, vector<1x24x32xf32>,
    %48 = vector.extract_strided_slice %43 {offsets = [24, 0], sizes = [24, 32], strides = [1, 1]} : vector<48x32xf32> to vector<24x32xf32>
    %c1_61 = arith.constant 1 : index
    %c8_62 = arith.constant 8 : index
    %c0_63 = arith.constant 0 : index
    %49 = vector.load %arg8[%c1_61, %c8_62, %c0_63] : memref<2x34x32xf32, #tpu.memory_space<vmem>>, vector<1x24x32xf32>
    %50 = vector.shape_cast %49 : vector<1x24x32xf32> to vector<24x32xf32>
    %51 = vector.shape_cast %48 : vector<24x32xf32> to vector<1x24x32xf32>
    tpu.vector_store %arg8[%c1_61, %c8_62, %c0_63], %51 {strides = array<i32>} : memref<2x34x32xf32, #tpu.memory_space<vmem>>, vector<1x24x32xf32>,
    %c0_64 = arith.constant 0 : index
    %c6_65 = arith.constant 6 : index
    %c0_66 = arith.constant 0 : index
    %52 = vector.load %arg8[%c0_64, %c6_65, %c0_66] : memref<2x34x32xf32, #tpu.memory_space<vmem>>, vector<1x24x32xf32>
    %53 = vector.shape_cast %52 : vector<1x24x32xf32> to vector<24x32xf32>
    %c0_67 = arith.constant 0 : index
    %c0_68 = arith.constant 0 : index
    %54 = vector.load %arg9[%c0_67, %c0_68] : memref<48x640xf32, #tpu.memory_space<vmem>>, vector<24x32xf32>
    tpu.vector_store %arg9[%c0_67, %c0_68], %53 {strides = array<i32>} : memref<48x640xf32, #tpu.memory_space<vmem>>, vector<24x32xf32>,
    %c0_69 = arith.constant 0 : index
    %c7_70 = arith.constant 7 : index
    %c0_71 = arith.constant 0 : index
    %55 = vector.load %arg8[%c0_69, %c7_70, %c0_71] : memref<2x34x32xf32, #tpu.memory_space<vmem>>, vector<1x24x32xf32>
    %56 = vector.shape_cast %55 : vector<1x24x32xf32> to vector<24x32xf32>
    %c0_72 = arith.constant 0 : index
    %c128_73 = arith.constant 128 : index
    %57 = vector.load %arg9[%c0_72, %c128_73] : memref<48x640xf32, #tpu.memory_space<vmem>>, vector<24x32xf32>
    tpu.vector_store %arg9[%c0_72, %c128_73], %56 {strides = array<i32>} : memref<48x640xf32, #tpu.memory_space<vmem>>, vector<24x32xf32>,
    %c0_74 = arith.constant 0 : index
    %c8_75 = arith.constant 8 : index
    %c0_76 = arith.constant 0 : index
    %58 = vector.load %arg8[%c0_74, %c8_75, %c0_76] : memref<2x34x32xf32, #tpu.memory_space<vmem>>, vector<1x24x32xf32>
    %59 = vector.shape_cast %58 : vector<1x24x32xf32> to vector<24x32xf32>
    %c0_77 = arith.constant 0 : index
    %c256_78 = arith.constant 256 : index
    %60 = vector.load %arg9[%c0_77, %c256_78] : memref<48x640xf32, #tpu.memory_space<vmem>>, vector<24x32xf32>
    tpu.vector_store %arg9[%c0_77, %c256_78], %59 {strides = array<i32>} : memref<48x640xf32, #tpu.memory_space<vmem>>, vector<24x32xf32>,
    %c0_79 = arith.constant 0 : index
    %c9_80 = arith.constant 9 : index
    %c0_81 = arith.constant 0 : index
    %61 = vector.load %arg8[%c0_79, %c9_80, %c0_81] : memref<2x34x32xf32, #tpu.memory_space<vmem>>, vector<1x24x32xf32>
    %62 = vector.shape_cast %61 : vector<1x24x32xf32> to vector<24x32xf32>
    %c0_82 = arith.constant 0 : index
    %c384_83 = arith.constant 384 : index
    %63 = vector.load %arg9[%c0_82, %c384_83] : memref<48x640xf32, #tpu.memory_space<vmem>>, vector<24x32xf32>
    tpu.vector_store %arg9[%c0_82, %c384_83], %62 {strides = array<i32>} : memref<48x640xf32, #tpu.memory_space<vmem>>, vector<24x32xf32>,
    %c0_84 = arith.constant 0 : index
    %c10_85 = arith.constant 10 : index
    %c0_86 = arith.constant 0 : index
    %64 = vector.load %arg8[%c0_84, %c10_85, %c0_86] : memref<2x34x32xf32, #tpu.memory_space<vmem>>, vector<1x24x32xf32>
    %65 = vector.shape_cast %64 : vector<1x24x32xf32> to vector<24x32xf32>
    %c0_87 = arith.constant 0 : index
    %c512_88 = arith.constant 512 : index
    %66 = vector.load %arg9[%c0_87, %c512_88] : memref<48x640xf32, #tpu.memory_space<vmem>>, vector<24x32xf32>
    tpu.vector_store %arg9[%c0_87, %c512_88], %65 {strides = array<i32>} : memref<48x640xf32, #tpu.memory_space<vmem>>, vector<24x32xf32>,
    %c1_89 = arith.constant 1 : index
    %c6_90 = arith.constant 6 : index
    %c0_91 = arith.constant 0 : index
    %67 = vector.load %arg8[%c1_89, %c6_90, %c0_91] : memref<2x34x32xf32, #tpu.memory_space<vmem>>, vector<1x24x32xf32>
    %68 = vector.shape_cast %67 : vector<1x24x32xf32> to vector<24x32xf32>
    %c24_92 = arith.constant 24 : index
    %c0_93 = arith.constant 0 : index
    %69 = vector.load %arg9[%c24_92, %c0_93] : memref<48x640xf32, #tpu.memory_space<vmem>>, vector<24x32xf32>
    tpu.vector_store %arg9[%c24_92, %c0_93], %68 {strides = array<i32>} : memref<48x640xf32, #tpu.memory_space<vmem>>, vector<24x32xf32>,
    %c1_94 = arith.constant 1 : index
    %c7_95 = arith.constant 7 : index
    %c0_96 = arith.constant 0 : index
    %70 = vector.load %arg8[%c1_94, %c7_95, %c0_96] : memref<2x34x32xf32, #tpu.memory_space<vmem>>, vector<1x24x32xf32>
    %71 = vector.shape_cast %70 : vector<1x24x32xf32> to vector<24x32xf32>
    %c24_97 = arith.constant 24 : index
    %c128_98 = arith.constant 128 : index
    %72 = vector.load %arg9[%c24_97, %c128_98] : memref<48x640xf32, #tpu.memory_space<vmem>>, vector<24x32xf32>
    tpu.vector_store %arg9[%c24_97, %c128_98], %71 {strides = array<i32>} : memref<48x640xf32, #tpu.memory_space<vmem>>, vector<24x32xf32>,
    %c1_99 = arith.constant 1 : index
    %c8_100 = arith.constant 8 : index
    %c0_101 = arith.constant 0 : index
    %73 = vector.load %arg8[%c1_99, %c8_100, %c0_101] : memref<2x34x32xf32, #tpu.memory_space<vmem>>, vector<1x24x32xf32>
    %74 = vector.shape_cast %73 : vector<1x24x32xf32> to vector<24x32xf32>
    %c24_102 = arith.constant 24 : index
    %c256_103 = arith.constant 256 : index
    %75 = vector.load %arg9[%c24_102, %c256_103] : memref<48x640xf32, #tpu.memory_space<vmem>>, vector<24x32xf32>
    tpu.vector_store %arg9[%c24_102, %c256_103], %74 {strides = array<i32>} : memref<48x640xf32, #tpu.memory_space<vmem>>, vector<24x32xf32>,
    %c1_104 = arith.constant 1 : index
    %c9_105 = arith.constant 9 : index
    %c0_106 = arith.constant 0 : index
    %76 = vector.load %arg8[%c1_104, %c9_105, %c0_106] : memref<2x34x32xf32, #tpu.memory_space<vmem>>, vector<1x24x32xf32>
    %77 = vector.shape_cast %76 : vector<1x24x32xf32> to vector<24x32xf32>
    %c24_107 = arith.constant 24 : index
    %c384_108 = arith.constant 384 : index
    %78 = vector.load %arg9[%c24_107, %c384_108] : memref<48x640xf32, #tpu.memory_space<vmem>>, vector<24x32xf32>
    tpu.vector_store %arg9[%c24_107, %c384_108], %77 {strides = array<i32>} : memref<48x640xf32, #tpu.memory_space<vmem>>, vector<24x32xf32>,
    %c1_109 = arith.constant 1 : index
    %c10_110 = arith.constant 10 : index
    %c0_111 = arith.constant 0 : index
    %79 = vector.load %arg8[%c1_109, %c10_110, %c0_111] : memref<2x34x32xf32, #tpu.memory_space<vmem>>, vector<1x24x32xf32>
    %80 = vector.shape_cast %79 : vector<1x24x32xf32> to vector<24x32xf32>
    %c24_112 = arith.constant 24 : index
    %c512_113 = arith.constant 512 : index
    %81 = vector.load %arg9[%c24_112, %c512_113] : memref<48x640xf32, #tpu.memory_space<vmem>>, vector<24x32xf32>
    tpu.vector_store %arg9[%c24_112, %c512_113], %80 {strides = array<i32>} : memref<48x640xf32, #tpu.memory_space<vmem>>, vector<24x32xf32>,
    %c0_114 = arith.constant 0 : index
    %c0_115 = arith.constant 0 : index
    %82 = vector.load %arg9[%c0_114, %c0_115] : memref<48x640xf32, #tpu.memory_space<vmem>>, vector<48x640xf32>
    %c0_116 = arith.constant 0 : index
    %c0_117 = arith.constant 0 : index
    %83 = vector.load %arg3[%c0_116, %c0_117] : memref<640x32xf32, #tpu.memory_space<vmem>>, vector<640x32xf32>
    %cst_118 = arith.constant dense<0.000000e+00> : vector<48x32xf32>
    %84 = tpu.matmul %82, %83, %cst_118 {dimension_numbers = #tpu.dot_dimension_numbers<[1], [0], [0], [1], [0, 0, 1, 1], [], []>} : vector<48x640xf32>, vector<640x32xf32>, vector<48x32xf32> -> vector<48x32xf32>
    %c0_119 = arith.constant 0 : index
    %c0_120 = arith.constant 0 : index
    %85 = vector.load %arg4[%c0_119, %c0_120] : memref<1x32xf32, #tpu.memory_space<vmem>>, vector<1x32xf32>
    %86 = vector.broadcast %85 : vector<1x32xf32> to vector<48x32xf32>
    %87 = arith.addf %84, %86 : vector<48x32xf32>
    %cst_121 = arith.constant 0.000000e+00 : f32
    %88 = vector.broadcast %cst_121 : f32 to vector<48x32xf32>
    %89 = arith.maximumf %87, %88 : vector<48x32xf32>
    %90 = vector.extract_strided_slice %89 {offsets = [0, 0], sizes = [24, 32], strides = [1, 1]} : vector<48x32xf32> to vector<24x32xf32>
    %c0_122 = arith.constant 0 : index
    %c8_123 = arith.constant 8 : index
    %c0_124 = arith.constant 0 : index
    %91 = vector.load %arg8[%c0_122, %c8_123, %c0_124] : memref<2x34x32xf32, #tpu.memory_space<vmem>>, vector<1x24x32xf32>
    %92 = vector.shape_cast %91 : vector<1x24x32xf32> to vector<24x32xf32>
    %93 = vector.shape_cast %90 : vector<24x32xf32> to vector<1x24x32xf32>
    tpu.vector_store %arg8[%c0_122, %c8_123, %c0_124], %93 {strides = array<i32>} : memref<2x34x32xf32, #tpu.memory_space<vmem>>, vector<1x24x32xf32>,
    %94 = vector.extract_strided_slice %89 {offsets = [24, 0], sizes = [24, 32], strides = [1, 1]} : vector<48x32xf32> to vector<24x32xf32>
    %c1_125 = arith.constant 1 : index
    %c8_126 = arith.constant 8 : index
    %c0_127 = arith.constant 0 : index
    %95 = vector.load %arg8[%c1_125, %c8_126, %c0_127] : memref<2x34x32xf32, #tpu.memory_space<vmem>>, vector<1x24x32xf32>
    %96 = vector.shape_cast %95 : vector<1x24x32xf32> to vector<24x32xf32>
    %97 = vector.shape_cast %94 : vector<24x32xf32> to vector<1x24x32xf32>
    tpu.vector_store %arg8[%c1_125, %c8_126, %c0_127], %97 {strides = array<i32>} : memref<2x34x32xf32, #tpu.memory_space<vmem>>, vector<1x24x32xf32>,
    %c0_128 = arith.constant 0 : index
    %c0_129 = arith.constant 0 : index
    %98 = vector.load %arg5[%c0_128, %c0_129] : memref<3x32xf32, #tpu.memory_space<vmem>>, vector<3x32xf32>
    %cst_130 = arith.constant 0.000000e+00 : f32
    %99 = vector.broadcast %cst_130 : f32 to vector<2x24xf32>
    %c0_131 = arith.constant 0 : index
    %c0_132 = arith.constant 0 : index
    %100 = vector.load %arg6[%c0_131, %c0_132] : memref<1x1xf32, #tpu.memory_space<vmem>>, vector<1x1xf32>
    %101 = vector.broadcast %100 : vector<1x1xf32> to vector<2x24xf32>
    %102 = arith.addf %99, %101 : vector<2x24xf32>
    %c0_133 = arith.constant 0 : index
    %c7_134 = arith.constant 7 : index
    %c0_135 = arith.constant 0 : index
    %103 = vector.load %arg8[%c0_133, %c7_134, %c0_135] : memref<2x34x32xf32, #tpu.memory_space<vmem>>, vector<2x24x32xf32>
    %104 = vector.extract_strided_slice %98 {offsets = [0, 0], sizes = [1, 32], strides = [1, 1]} : vector<3x32xf32> to vector<1x32xf32>
    %105 = vector.shape_cast %104 : vector<1x32xf32> to vector<32xf32>
    %106 = vector.shape_cast %105 : vector<32xf32> to vector<1x1x32xf32>
    %107 = vector.broadcast %106 : vector<1x1x32xf32> to vector<2x24x32xf32>
    %108 = arith.mulf %103, %107 : vector<2x24x32xf32>
    %cst_136 = arith.constant dense<0.000000e+00> : vector<2x24xf32>
    %109 = vector.multi_reduction <add>, %108, %cst_136 [2] : vector<2x24x32xf32> to vector<2x24xf32>
    %110 = arith.addf %102, %109 : vector<2x24xf32>
    %c0_137 = arith.constant 0 : index
    %c8_138 = arith.constant 8 : index
    %c0_139 = arith.constant 0 : index
    %111 = vector.load %arg8[%c0_137, %c8_138, %c0_139] : memref<2x34x32xf32, #tpu.memory_space<vmem>>, vector<2x24x32xf32>
    %112 = vector.extract_strided_slice %98 {offsets = [1, 0], sizes = [1, 32], strides = [1, 1]} : vector<3x32xf32> to vector<1x32xf32>
    %113 = vector.shape_cast %112 : vector<1x32xf32> to vector<32xf32>
    %114 = vector.shape_cast %113 : vector<32xf32> to vector<1x1x32xf32>
    %115 = vector.broadcast %114 : vector<1x1x32xf32> to vector<2x24x32xf32>
    %116 = arith.mulf %111, %115 : vector<2x24x32xf32>
    %cst_140 = arith.constant dense<0.000000e+00> : vector<2x24xf32>
    %117 = vector.multi_reduction <add>, %116, %cst_140 [2] : vector<2x24x32xf32> to vector<2x24xf32>
    %118 = arith.addf %110, %117 : vector<2x24xf32>
    %c0_141 = arith.constant 0 : index
    %c9_142 = arith.constant 9 : index
    %c0_143 = arith.constant 0 : index
    %119 = vector.load %arg8[%c0_141, %c9_142, %c0_143] : memref<2x34x32xf32, #tpu.memory_space<vmem>>, vector<2x24x32xf32>
    %120 = vector.extract_strided_slice %98 {offsets = [2, 0], sizes = [1, 32], strides = [1, 1]} : vector<3x32xf32> to vector<1x32xf32>
    %121 = vector.shape_cast %120 : vector<1x32xf32> to vector<32xf32>
    %122 = vector.shape_cast %121 : vector<32xf32> to vector<1x1x32xf32>
    %123 = vector.broadcast %122 : vector<1x1x32xf32> to vector<2x24x32xf32>
    %124 = arith.mulf %119, %123 : vector<2x24x32xf32>
    %cst_144 = arith.constant dense<0.000000e+00> : vector<2x24xf32>
    %125 = vector.multi_reduction <add>, %124, %cst_144 [2] : vector<2x24x32xf32> to vector<2x24xf32>
    %126 = arith.addf %118, %125 : vector<2x24xf32>
    %127 = tpu.iota {dimensions = array<i32: 1>} : vector<2x24xi32>
    %c6_i32 = arith.constant 6 : i32
    %128 = vector.broadcast %c6_i32 : i32 to vector<2x24xi32>
    %129 = arith.cmpi sge, %127, %128 : vector<2x24xi32>
    %c21_i32 = arith.constant 21 : i32
    %130 = vector.broadcast %c21_i32 : i32 to vector<2x24xi32>
    %131 = arith.cmpi slt, %127, %130 : vector<2x24xi32>
    %132 = arith.andi %129, %131 : vector<2x24xi1>
    %133 = arith.extui %132 : vector<2x24xi1> to vector<2x24xi32>
    %134 = arith.sitofp %133 : vector<2x24xi32> to vector<2x24xf32>
    %135 = arith.negf %126 : vector<2x24xf32>
    %136 = math.exp %135 : vector<2x24xf32>
    %cst_145 = arith.constant 1.000000e+00 : f32
    %137 = vector.broadcast %cst_145 : f32 to vector<2x24xf32>
    %138 = arith.addf %137, %136 : vector<2x24xf32>
    %139 = arith.divf %137, %138 : vector<2x24xf32>
    %cst_146 = arith.constant 5.000000e+00 : f32
    %140 = vector.broadcast %cst_146 : f32 to vector<2x24xf32>
    %141 = arith.mulf %140, %139 : vector<2x24xf32>
    %142 = arith.mulf %141, %134 : vector<2x24xf32>
    %c0_147 = arith.constant 0 : index
    %c0_148 = arith.constant 0 : index
    %143 = vector.load %arg7[%c0_147, %c0_148] : memref<2x24xf32, #tpu.memory_space<vmem>>, vector<2x24xf32>
    tpu.vector_store %arg7[%c0_147, %c0_148], %142 {strides = array<i32>} : memref<2x24xf32, #tpu.memory_space<vmem>>, vector<2x24xf32>,
    return
  }
}

</mosaic_0001>

<bundles_post_ra>
// kernel: tpu_custom_call.1
= control target key start
LH: loop header
LB: loop body
LE: loop exit
PB: predicated region body
PF: predicated region fallthrough
CT: control target
= control target key end

     0   :  { %s2419_s0 = inlined_call_operand.vmem [shape: f32[2,24,12], index: 0, kind: input, shape index: {}]   ;;  %s2420_s1 = inlined_call_operand.vmem [shape: f32[640,32], index: 1, kind: input, shape index: {}]   ;;  %s2421_s2 = inlined_call_operand.vmem [shape: f32[1,32], index: 2, kind: input, shape index: {}]   ;;  %s2422_s3 = inlined_call_operand.vmem [shape: f32[640,32], index: 3, kind: input, shape index: {}]   ;;  %s2423_s4 = inlined_call_operand.vmem [shape: f32[1,32], index: 4, kind: input, shape index: {}]   ;;  %s2424_s5 = inlined_call_operand.vmem [shape: f32[3,32], index: 5, kind: input, shape index: {}]   ;;  %s2425_s6 = inlined_call_operand.<no memory space> [shape: f32[1,1], index: 6, kind: input, shape index: {}]   ;;  %s2426_s7 = inlined_call_operand.hbm [shape: f32[2,24], index: 7, kind: output, shape index: {}]  }
   0x1   :  { %v12_v0 = vstv %s2425_s6 }
   0x2   :  { %13 = vst [vmem:[#allocation4] sm:$0x1] %v12_v0 }
   0x3   :  { %v206_v1 = vld [vmem:[%s2420_s1 + $0xf8] sm:$0xff]  ;;  %v205_v3 = vld [vmem:[%s2420_s1 + $0xf0] sm:$0xff]  ;;  %vm29_vm0 = vcmask 261120   ;;  %v1697_v7 = vmov 0.0   ;;  %vm34_vm1 = vcmask 254976   ;;  %v204_v8 = vld [vmem:[%s2420_s1 + $0xe8] sm:$0xff] }
   0x4   :  { %v190_v2 = vld [vmem:[%s2420_s1 + $0x78] sm:$0xff]  ;;  %1320 = vmatprep.subr.mxu0 %v206_v1  ;;  %v189_v5 = vld [vmem:[%s2420_s1 + $0x70] sm:$0xff]  ;;  %30 = vst.msk [vmem:[#allocation2] sm:$0xff] %vm29_vm0, %v1697_v7  ;;  %31 = vst.msk [vmem:[#allocation2 + $0x8] sm:$0xff] %vm29_vm0, %v1697_v7  ;;  %vm77_vm2 = vcmask 97280  }
   0x5   :  { %v238_v4 = vld [vmem:[%s2420_s1 + $0x1f8] sm:$0xff]  ;;  %42 = vst [vmem:[#allocation3 + $0x8] sm:$0xff] %v1697_v7  ;;  %32 = vst.msk [vmem:[#allocation2 + $0x10] sm:$0xff] %vm29_vm0, %v1697_v7  ;;  %1321 = vmatpush3.msra.mxu0 %v190_v2  ;;  %v237_v9 = vld [vmem:[%s2420_s1 + $0x1f0] sm:$0xff] }
   0x6   :  { %v222_v6 = vld [vmem:[%s2420_s1 + $0x178] sm:$0xff]  ;;  %33 = vst.msk [vmem:[#allocation2 + $0x18] sm:$0xff] %vm29_vm0, %v1697_v7  ;;  %36 = vst.msk [vmem:[#allocation2 + $0x28] sm:$0xff] %vm29_vm0, %v1697_v7  ;;  %1370 = vmatprep.subr.mxu1 %v238_v4  ;;  %1322 = vmatprep.subr.mxu0 %v205_v3  ;;  %v188_v10 = vld [vmem:[%s2420_s1 + $0x68] sm:$0xff] }
   0x7   :  { %37 = vst.msk [vmem:[#allocation2 + $0x30] sm:$0xff] %vm29_vm0, %v1697_v7  ;;  %38 = vst.msk [vmem:[#allocation2 + $0x38] sm:$0xff] %vm29_vm0, %v1697_v7  ;;  %1371 = vmatpush3.msra.mxu1 %v222_v6  ;;  %v221_v11 = vld [vmem:[%s2420_s1 + $0x170] sm:$0xff]  ;;  %v236_v12 = vld [vmem:[%s2420_s1 + $0x1e8] sm:$0xff]  ;;  %1323 = vmatpush3.msra.mxu0 %v189_v5 }
   0x8   :  { %39 = vst.msk [vmem:[#allocation2 + $0x40] sm:$0xff] %vm29_vm0, %v1697_v7  ;;  %41 = vst [vmem:[#allocation3] sm:$0xff] %v1697_v7  ;;  %1372 = vmatprep.subr.mxu1 %v237_v9  ;;  %v203_v13 = vld [vmem:[%s2420_s1 + $0xe0] sm:$0xff]  ;;  %v220_v14 = vld [vmem:[%s2420_s1 + $0x168] sm:$0xff]  ;;  %1324 = vmatprep.subr.mxu0 %v204_v8 }
   0x9   :  { %43 = vst [vmem:[#allocation3 + $0x10] sm:$0xff] %v1697_v7  ;;  %44 = vst [vmem:[#allocation3 + $0x18] sm:$0xff] %v1697_v7  ;;  %1373 = vmatpush3.msra.mxu1 %v221_v11  ;;  %v187_v15 = vld [vmem:[%s2420_s1 + $0x60] sm:$0xff]  ;;  %1325 = vmatpush3.msra.mxu0 %v188_v10  ;;  %v202_v17 = vld [vmem:[%s2420_s1 + $0xd8] sm:$0xff] }
   0xa   :  { %45 = vst [vmem:[#allocation3 + $0x20] sm:$0xff] %v1697_v7  ;;  %46 = vst [vmem:[#allocation3 + $0x28] sm:$0xff] %v1697_v7  ;;  %v235_v16 = vld [vmem:[%s2420_s1 + $0x1e0] sm:$0xff]  ;;  %1374 = vmatprep.subr.mxu1 %v236_v12  ;;  %1326 = vmatprep.subr.mxu0 %v203_v13  ;;  %v186_v19 = vld [vmem:[%s2420_s1 + $0x58] sm:$0xff] }
   0xb   :  { %47 = vst [vmem:[#allocation3 + $0x30] sm:$0xff] %v1697_v7  ;;  %48 = vst [vmem:[#allocation3 + $0x38] sm:$0xff] %v1697_v7  ;;  %v219_v18 = vld [vmem:[%s2420_s1 + $0x160] sm:$0xff]  ;;  %1375 = vmatpush3.msra.mxu1 %v220_v14  ;;  %v234_v20 = vld [vmem:[%s2420_s1 + $0x1d8] sm:$0xff]  ;;  %1327 = vmatpush3.msra.mxu0 %v187_v15 }
   0xc   :  { %49 = vst [vmem:[#allocation3 + $0x40] sm:$0xff] %v1697_v7  ;;  %50 = vst [vmem:[#allocation3 + $0x48] sm:$0xff] %v1697_v7  ;;  %1376 = vmatprep.subr.mxu1 %v235_v16  ;;  %v201_v21 = vld [vmem:[%s2420_s1 + $0xd0] sm:$0xff]  ;;  %v218_v22 = vld [vmem:[%s2420_s1 + $0x158] sm:$0xff]  ;;  %1328 = vmatprep.subr.mxu0 %v202_v17 }
   0xd   :  { %51 = vst [vmem:[#allocation3 + $0x50] sm:$0xff] %v1697_v7  ;;  %52 = vst [vmem:[#allocation3 + $0x58] sm:$0xff] %v1697_v7  ;;  %1377 = vmatpush3.msra.mxu1 %v219_v18  ;;  %v185_v23 = vld [vmem:[%s2420_s1 + $0x50] sm:$0xff]  ;;  %1329 = vmatpush3.msra.mxu0 %v186_v19  ;;  %v200_v25 = vld [vmem:[%s2420_s1 + $0xc8] sm:$0xff] }
   0xe   :  { %53 = vst [vmem:[#allocation3 + $0x60] sm:$0xff] %v1697_v7  ;;  %54 = vst [vmem:[#allocation3 + $0x68] sm:$0xff] %v1697_v7  ;;  %v233_v24 = vld [vmem:[%s2420_s1 + $0x1d0] sm:$0xff]  ;;  %1378 = vmatprep.subr.mxu1 %v234_v20  ;;  %1330 = vmatprep.subr.mxu0 %v201_v21  ;;  %v184_v27 = vld [vmem:[%s2420_s1 + $0x48] sm:$0xff] }
   0xf   :  { %55 = vst [vmem:[#allocation3 + $0x70] sm:$0xff] %v1697_v7  ;;  %56 = vst [vmem:[#allocation3 + $0x78] sm:$0xff] %v1697_v7  ;;  %v217_v26 = vld [vmem:[%s2420_s1 + $0x150] sm:$0xff]  ;;  %1379 = vmatpush3.msra.mxu1 %v218_v22  ;;  %v232_v28 = vld [vmem:[%s2420_s1 + $0x1c8] sm:$0xff]  ;;  %1331 = vmatpush3.msra.mxu0 %v185_v23 }
  0x10   :  { %57 = vst [vmem:[#allocation3 + $0x80] sm:$0xff] %v1697_v7  ;;  %58 = vst [vmem:[#allocation3 + $0x88] sm:$0xff] %v1697_v7  ;;  %1380 = vmatprep.subr.mxu1 %v233_v24  ;;  %v199_v29 = vld [vmem:[%s2420_s1 + $0xc0] sm:$0xff]  ;;  %v216_v30 = vld [vmem:[%s2420_s1 + $0x148] sm:$0xff]  ;;  %1332 = vmatprep.subr.mxu0 %v200_v25 }
  0x11   :  { %59 = vst [vmem:[#allocation3 + $0x90] sm:$0xff] %v1697_v7  ;;  %60 = vst [vmem:[#allocation3 + $0x98] sm:$0xff] %v1697_v7  ;;  %1381 = vmatpush3.msra.mxu1 %v217_v26  ;;  %v183_v31 = vld [vmem:[%s2420_s1 + $0x40] sm:$0xff]  ;;  %1333 = vmatpush3.msra.mxu0 %v184_v27  ;;  %v198_v33 = vld [vmem:[%s2420_s1 + $0xb8] sm:$0xff] }
  0x12   :  { %61 = vst [vmem:[#allocation3 + $0xa0] sm:$0xff] %v1697_v7  ;;  %62 = vst [vmem:[#allocation3 + $0xa8] sm:$0xff] %v1697_v7  ;;  %v231_v32 = vld [vmem:[%s2420_s1 + $0x1c0] sm:$0xff]  ;;  %1382 = vmatprep.subr.mxu1 %v232_v28  ;;  %1334 = vmatprep.subr.mxu0 %v199_v29  ;;  %v182_v35 = vld [vmem:[%s2420_s1 + $0x38] sm:$0xff] }
  0x13   :  { %63 = vst [vmem:[#allocation3 + $0xb0] sm:$0xff] %v1697_v7  ;;  %64 = vst [vmem:[#allocation3 + $0xb8] sm:$0xff] %v1697_v7  ;;  %v215_v34 = vld [vmem:[%s2420_s1 + $0x140] sm:$0xff]  ;;  %1383 = vmatpush3.msra.mxu1 %v216_v30  ;;  %v230_v36 = vld [vmem:[%s2420_s1 + $0x1b8] sm:$0xff]  ;;  %1335 = vmatpush3.msra.mxu0 %v183_v31 }
  0x14   :  { %65 = vst [vmem:[#allocation3 + $0xc0] sm:$0xff] %v1697_v7  ;;  %66 = vst [vmem:[#allocation3 + $0xc8] sm:$0xff] %v1697_v7  ;;  %1384 = vmatprep.subr.mxu1 %v231_v32  ;;  %v197_v37 = vld [vmem:[%s2420_s1 + $0xb0] sm:$0xff]  ;;  %v214_v38 = vld [vmem:[%s2420_s1 + $0x138] sm:$0xff]  ;;  %1336 = vmatprep.subr.mxu0 %v198_v33 }
  0x15   :  { %67 = vst [vmem:[#allocation3 + $0xd0] sm:$0xff] %v1697_v7  ;;  %68 = vst [vmem:[#allocation3 + $0xd8] sm:$0xff] %v1697_v7  ;;  %1385 = vmatpush3.msra.mxu1 %v215_v34  ;;  %v181_v39 = vld [vmem:[%s2420_s1 + $0x30] sm:$0xff]  ;;  %1337 = vmatpush3.msra.mxu0 %v182_v35  ;;  %v196_v41 = vld [vmem:[%s2420_s1 + $0xa8] sm:$0xff] }
  0x16   :  { %69 = vst [vmem:[#allocation3 + $0xe0] sm:$0xff] %v1697_v7  ;;  %70 = vst [vmem:[#allocation3 + $0xe8] sm:$0xff] %v1697_v7  ;;  %v229_v40 = vld [vmem:[%s2420_s1 + $0x1b0] sm:$0xff]  ;;  %1386 = vmatprep.subr.mxu1 %v230_v36  ;;  %1338 = vmatprep.subr.mxu0 %v197_v37  ;;  %v180_v43 = vld [vmem:[%s2420_s1 + $0x28] sm:$0xff] }
  0x17   :  { %35 = vst.msk [vmem:[#allocation2 + $0x20] sm:$0x3] %vm34_vm1, %v1697_v7  ;;  %40 = vst.msk [vmem:[#allocation2 + $0x48] sm:$0x3] %vm34_vm1, %v1697_v7  ;;  %v213_v42 = vld [vmem:[%s2420_s1 + $0x130] sm:$0xff]  ;;  %1387 = vmatpush3.msra.mxu1 %v214_v38  ;;  %v195_v44 = vld [vmem:[%s2420_s1 + $0xa0] sm:$0xff]  ;;  %1339 = vmatpush3.msra.mxu0 %v181_v39 }
  0x18   :  { %v228_v45 = vld [vmem:[%s2420_s1 + $0x1a8] sm:$0xff]  ;;  %1388 = vmatprep.subr.mxu1 %v229_v40  ;;  %v179_v46 = vld [vmem:[%s2420_s1 + $0x20] sm:$0xff]  ;;  %1340 = vmatprep.subr.mxu0 %v196_v41  ;;  %v194_v49 = vld [vmem:[%s2420_s1 + $0x98] sm:$0xff] }
  0x19   :  { %v212_v47 = vld [vmem:[%s2420_s1 + $0x128] sm:$0xff]  ;;  %v71_v48 = vld [vmem:[%s2419_s0] sm:$0xff]  ;;  %1389 = vmatpush3.msra.mxu1 %v213_v42  ;;  %v178_v51 = vld [vmem:[%s2420_s1 + $0x18] sm:$0xff]  ;;  %1341 = vmatpush3.msra.mxu0 %v180_v43 }
  0x1a   :  { %v227_v50 = vld [vmem:[%s2420_s1 + $0x1a0] sm:$0xff]  ;;  %78 = vst.msk [vmem:[#allocation2 + $0x8] sm:$0xff] %vm77_vm2, %v71_v48  ;;  %1390 = vmatprep.subr.mxu1 %v228_v45  ;;  %v193_v53 = vld [vmem:[%s2420_s1 + $0x90] sm:$0xff]  ;;  %v72_v54 = vld [vmem:[%s2419_s0 + $0x8] sm:$0xff]  ;;  %1342 = vmatprep.subr.mxu0 %v195_v44 }
  0x1b   :  { %v211_v52 = vld [vmem:[%s2420_s1 + $0x120] sm:$0xff]  ;;  %1391 = vmatpush3.msra.mxu1 %v212_v47  ;;  %v226_v55 = vld [vmem:[%s2420_s1 + $0x198] sm:$0xff]  ;;  %v177_v56 = vld [vmem:[%s2420_s1 + $0x10] sm:$0xff]  ;;  %79 = vst.msk [vmem:[#allocation2 + $0x10] sm:$0xff] %vm77_vm2, %v72_v54  ;;  %1343 = vmatpush3.msra.mxu0 %v179_v46 }
  0x1c   :  { %v210_v57 = vld [vmem:[%s2420_s1 + $0x118] sm:$0xff]  ;;  %1392 = vmatprep.subr.mxu1 %v227_v50  ;;  %v192_v58 = vld [vmem:[%s2420_s1 + $0x88] sm:$0xff]  ;;  %v225_v59 = vld [vmem:[%s2420_s1 + $0x190] sm:$0xff]  ;;  %1344 = vmatprep.subr.mxu0 %v194_v49 }
  0x1d   :  { %v73_v60 = vld [vmem:[%s2419_s0 + $0x10] sm:$0xff]  ;;  %1393 = vmatpush3.msra.mxu1 %v211_v52  ;;  %v176_v61 = vld [vmem:[%s2420_s1 + $0x8] sm:$0xff]  ;;  %v74_v63 = vld [vmem:[%s2419_s0 + $0x18] sm:$0xff]  ;;  %1345 = vmatpush3.msra.mxu0 %v178_v51 }
  0x1e   :  { %v209_v62 = vld [vmem:[%s2420_s1 + $0x110] sm:$0xff]  ;;  %80 = vst.msk [vmem:[#allocation2 + $0x18] sm:$0xff] %vm77_vm2, %v73_v60  ;;  %1394 = vmatprep.subr.mxu1 %v226_v55  ;;  %v191_v0 = vld [vmem:[%s2420_s1 + $0x80] sm:$0xff]  ;;  %v224_v1 = vld [vmem:[%s2420_s1 + $0x188] sm:$0xff]  ;;  %1346 = vmatprep.subr.mxu0 %v193_v53 }
  0x1f   :  { %81 = vst.msk [vmem:[#allocation2 + $0x30] sm:$0xff] %vm77_vm2, %v74_v63  ;;  %v75_v2 = vld [vmem:[%s2419_s0 + $0x20] sm:$0xff]  ;;  %1395 = vmatpush3.msra.mxu1 %v210_v57  ;;  %v208_v4 = vld [vmem:[%s2420_s1 + $0x108] sm:$0xff]  ;;  %1347 = vmatpush3.msra.mxu0 %v177_v56  ;;  %v254_v11 = vld [vmem:[%s2420_s1 + $0x278] sm:$0xff] }
  0x20   :  { %v175_v3 = vld [vmem:[%s2420_s1] sm:$0xff]  ;;  %82 = vst.msk [vmem:[#allocation2 + $0x38] sm:$0xff] %vm77_vm2, %v75_v2  ;;  %v76_v6 = vld [vmem:[%s2419_s0 + $0x28] sm:$0xff]  ;;  %1396 = vmatprep.subr.mxu1 %v225_v59  ;;  %1348 = vmatprep.subr.mxu0 %v192_v58 }
  0x21   :  { %v223_v5 = vld [vmem:[%s2420_s1 + $0x180] sm:$0xff]  ;;  %v96_v10 = vld [vmem:[#allocation2 + $0x8] sm:$0xff]  ;;  %83 = vst.msk [vmem:[#allocation2 + $0x40] sm:$0xff] %vm77_vm2, %v76_v6  ;;  %1397 = vmatpush3.msra.mxu1 %v209_v62 }
  0x22   :  { %v90_v8 = vld [vmem:[#allocation2 + $0x7] sm:$0xff]  ;;  %99 = vst.msk [vmem:[#allocation3 + $0x10] sm:$0xff] %vm77_vm2, %v96_v10 }
  0x23   :  { %v84_v9 = vld [vmem:[#allocation2 + $0x6] sm:$0xff]  ;;  %93 = vst.msk [vmem:[#allocation3 + $0x8] sm:$0xff] %vm77_vm2, %v90_v8 }
  0x24   :  { %87 = vst.msk [vmem:[#allocation3] sm:$0xff] %vm77_vm2, %v84_v9  ;;  %v207_v12 = vld [vmem:[%s2420_s1 + $0x100] sm:$0xff] }
  0x25   :  { %14 = vsyncpa [#allocation6], 0  ;;  %1349 = vmatpush3.msra.mxu0 %v176_v61  ;;  %1398 = vmatprep.subr.mxu1 %v224_v1  ;;  %v102_v13 = vld [vmem:[#allocation2 + $0x9] sm:$0xff]  ;;  %v103_v18 = vld [vmem:[#allocation2 + $0x11] sm:$0xff]  ;;  %vm1268_vm6 = vcmask 130112   ;;  %vm1275_vm7 = vcmask 195712  }
  0x26   :  { %v91_v14 = vld [vmem:[#allocation2 + $0xf] sm:$0xff]  ;;  %1350 = vmatprep.subr.mxu0 %v191_v0  ;;  %1399 = vmatpush3.msra.mxu1 %v208_v4  ;;  %105 = vst.msk [vmem:[#allocation3 + $0x18] sm:$0xff] %vm77_vm2, %v102_v13  ;;  %v92_v19 = vld [vmem:[#allocation2 + $0x17] sm:$0xff]  ;;  %106 = vst.msk [vmem:[#allocation3 + $0x40] sm:$0xff] %vm77_vm2, %v103_v18  ;;  %vm1291_vm8 = vcmask 1041409   ;;  %vm1294_vm9 = vcmask 189440  }
  0x27   :  { %v85_v15 = vld [vmem:[#allocation2 + $0xe] sm:$0xff]  ;;  %94 = vst.msk [vmem:[#allocation3 + $0x30] sm:$0xff] %vm77_vm2, %v91_v14  ;;  %1351 = vmatpush3.msra.mxu0 %v175_v3  ;;  %1400 = vmatprep.subr.mxu1 %v223_v5  ;;  %v86_v20 = vld [vmem:[#allocation2 + $0x16] sm:$0xff]  ;;  %95 = vst.msk [vmem:[#allocation3 + $0x58] sm:$0xff] %vm77_vm2, %v92_v19 }
  0x28   :  { %88 = vst.msk [vmem:[#allocation3 + $0x28] sm:$0xff] %vm77_vm2, %v85_v15  ;;  %v97_v16 = vld [vmem:[#allocation2 + $0x10] sm:$0xff]  ;;  %1564 = vmatprep.subr.mxu0 %v254_v11  ;;  %1401 = vmatpush3.msra.mxu1 %v207_v12  ;;  %89 = vst.msk [vmem:[#allocation3 + $0x50] sm:$0xff] %vm77_vm2, %v86_v20  ;;  %v104_v21 = vld [vmem:[#allocation2 + $0x19] sm:$0xff] }
  0x29   :  { %v108_v17 = vld [vmem:[#allocation2 + $0xa] sm:$0xff]  ;;  %100 = vst.msk [vmem:[#allocation3 + $0x38] sm:$0xff] %vm77_vm2, %v97_v16  ;;  %v98_v22 = vld [vmem:[#allocation2 + $0x18] sm:$0xff]  ;;  %107 = vst.msk [vmem:[#allocation3 + $0x68] sm:$0xff] %vm77_vm2, %v104_v21 }
  0x2a   :  { %111 = vst.msk [vmem:[#allocation3 + $0x20] sm:$0xff] %vm77_vm2, %v108_v17  ;;  %v121_v23 = vld [vmem:[#allocation2 + $0x2f] sm:$0xff]  ;;  %101 = vst.msk [vmem:[#allocation3 + $0x60] sm:$0xff] %vm77_vm2, %v98_v22  ;;  %v122_v28 = vld [vmem:[#allocation2 + $0x37] sm:$0xff] }
  0x2b   :  { %124 = vst.msk [vmem:[#allocation3 + $0x80] sm:$0xff] %vm77_vm2, %v121_v23  ;;  %v115_v24 = vld [vmem:[#allocation2 + $0x2e] sm:$0xff]  ;;  %v116_v29 = vld [vmem:[#allocation2 + $0x36] sm:$0xff]  ;;  %v147_v33 = vld [vmem:[#allocation3 + $0x10] sm:$0xff] }
  0x2c   :  { %v133_v25 = vld [vmem:[#allocation2 + $0x31] sm:$0xff]  ;;  %118 = vst.msk [vmem:[#allocation3 + $0x78] sm:$0xff] %vm77_vm2, %v115_v24  ;;  %v134_v30 = vld [vmem:[#allocation2 + $0x39] sm:$0xff]  ;;  %125 = vst.msk [vmem:[#allocation3 + $0xa8] sm:$0xff] %vm77_vm2, %v122_v28 }
  0x2d   :  { %v127_v26 = vld [vmem:[#allocation2 + $0x30] sm:$0xff]  ;;  %136 = vst.msk [vmem:[#allocation3 + $0x90] sm:$0xff] %vm77_vm2, %v133_v25  ;;  %v146_v31 = vld [vmem:[#allocation3 + $0x8] sm:$0xff]  ;;  %119 = vst.msk [vmem:[#allocation3 + $0xa0] sm:$0xff] %vm77_vm2, %v116_v29 }
  0x2e   :  { %v253_v27 = vld [vmem:[%s2420_s1 + $0x270] sm:$0xff]  ;;  %130 = vst.msk [vmem:[#allocation3 + $0x88] sm:$0xff] %vm77_vm2, %v127_v26  ;;  %137 = vst.msk [vmem:[#allocation3 + $0xb8] sm:$0xff] %vm77_vm2, %v134_v30  ;;  %326 = vmatprep.mubr.f32.mxu0 %v146_v31  ;;  %v128_v34 = vld [vmem:[#allocation2 + $0x38] sm:$0xff] }
  0x2f   :  { %v145_v32 = vld [vmem:[#allocation3] sm:$0xff]  ;;  %v123_v35 = vld [vmem:[#allocation2 + $0x3f] sm:$0xff]  ;;  %v148_v37 = vld [vmem:[#allocation3 + $0x18] sm:$0xff]  ;;  %131 = vst.msk [vmem:[#allocation3 + $0xb0] sm:$0xff] %vm77_vm2, %v128_v34 }
  0x30   :  { %v117_v36 = vld [vmem:[#allocation2 + $0x3e] sm:$0xff]  ;;  %327 = vmatmul.mubr.f32.vlgmr.msra.gmra.mxu0 %v145_v32  ;;  %v252_v38 = vld [vmem:[%s2420_s1 + $0x268] sm:$0xff]  ;;  %126 = vst.msk [vmem:[#allocation3 + $0xd0] sm:$0xff] %vm77_vm2, %v123_v35  ;;  %421 = vmatprep.mubr.f32.mxu1 %v148_v37  ;;  %v153_v43 = vld [vmem:[#allocation3 + $0x40] sm:$0xff] }
  0x31   :  { %v151_v39 = vld [vmem:[#allocation3 + $0x30] sm:$0xff]  ;;  %120 = vst.msk [vmem:[#allocation3 + $0xc8] sm:$0xff] %vm77_vm2, %v117_v36  ;;  %1565 = vmatpush3.msra.mxu0 %v254_v11  ;;  %v150_v40 = vld [vmem:[#allocation3 + $0x28] sm:$0xff]  ;;  %422 = vmatmul.mubr.f32.vlgmr.msra.gmra.mxu1 %v147_v33  ;;  %v152_v45 = vld [vmem:[#allocation3 + $0x38] sm:$0xff] }
  0x32   :  { %v135_v41 = vld [vmem:[#allocation2 + $0x41] sm:$0xff]  ;;  %1566 = vmatprep.subr.mxu0 %v253_v27  ;;  %331 = vmatprep.mubr.f32.mxu0 %v151_v39  ;;  %v250_v47 = vld [vmem:[%s2420_s1 + $0x258] sm:$0xff]  ;;  %v249_v52 = vld [vmem:[%s2420_s1 + $0x250] sm:$0xff] }
  0x33   :  { %v129_v42 = vld [vmem:[#allocation2 + $0x40] sm:$0xff]  ;;  %138 = vst.msk [vmem:[#allocation3 + $0xe0] sm:$0xff] %vm77_vm2, %v135_v41  ;;  %1567 = vmatpush3.msra.mxu0 %v253_v27  ;;  %v156_v46 = vld [vmem:[#allocation3 + $0x58] sm:$0xff]  ;;  %426 = vmatprep.mubr.f32.mxu1 %v153_v43  ;;  %v158_v49 = vld [vmem:[#allocation3 + $0x68] sm:$0xff] }
  0x34   :  { %132 = vst.msk [vmem:[#allocation3 + $0xd8] sm:$0xff] %vm77_vm2, %v129_v42  ;;  %v251_v44 = vld [vmem:[%s2420_s1 + $0x260] sm:$0xff]  ;;  %1568 = vmatprep.subr.mxu0 %v252_v38  ;;  %332 = vmatmul.mubr.f32.gmra.mxu0 %v150_v40  ;;  %v109_v50 = vld [vmem:[#allocation2 + $0x12] sm:$0xff]  ;;  %v248_v58 = vld [vmem:[%s2420_s1 + $0x248] sm:$0xff] }
  0x35   :  { %1569 = vmatpush3.msra.mxu0 %v252_v38  ;;  %v155_v48 = vld [vmem:[#allocation3 + $0x50] sm:$0xff]  ;;  %427 = vmatmul.mubr.f32.gmra.mxu1 %v152_v45  ;;  %v157_v53 = vld [vmem:[#allocation3 + $0x60] sm:$0xff]  ;;  %112 = vst.msk [vmem:[#allocation3 + $0x48] sm:$0xff] %vm77_vm2, %v109_v50  ;;  %v160_v59 = vld [vmem:[#allocation3 + $0x78] sm:$0xff] }
  0x36   :  { %1570 = vmatprep.subr.mxu0 %v251_v44  ;;  %v110_v51 = vld [vmem:[#allocation2 + $0x1a] sm:$0xff]  ;;  %336 = vmatprep.mubr.f32.mxu0 %v156_v46  ;;  %v161_v54 = vld [vmem:[#allocation3 + $0x80] sm:$0xff]  ;;  %v141_v57 = vld [vmem:[#allocation2 + $0x42] sm:$0xff] }
  0x37   :  { %1571 = vmatpush3.msra.mxu0 %v251_v44  ;;  %113 = vst.msk [vmem:[#allocation3 + $0x70] sm:$0xff] %vm77_vm2, %v110_v51  ;;  %v139_v55 = vld [vmem:[#allocation2 + $0x32] sm:$0xff]  ;;  %v140_v56 = vld [vmem:[#allocation2 + $0x3a] sm:$0xff]  ;;  %431 = vmatprep.mubr.f32.mxu1 %v158_v49  ;;  %144 = vst.msk [vmem:[#allocation3 + $0xe8] sm:$0xff] %vm77_vm2, %v141_v57 }
  0x38   :  { %1572 = vmatprep.subr.mxu0 %v250_v47  ;;  %337 = vmatmul.mubr.f32.gmra.mxu0 %v155_v48  ;;  %142 = vst.msk [vmem:[#allocation3 + $0x98] sm:$0xff] %vm77_vm2, %v139_v55  ;;  %143 = vst.msk [vmem:[#allocation3 + $0xc0] sm:$0xff] %vm77_vm2, %v140_v56  ;;  %v163_v60 = vld [vmem:[#allocation3 + $0x90] sm:$0xff]  ;;  %v162_v62 = vld [vmem:[#allocation3 + $0x88] sm:$0xff] }
  0x39   :  { %1573 = vmatpush3.msra.mxu0 %v250_v47  ;;  %432 = vmatmul.mubr.f32.gmra.mxu1 %v157_v53  ;;  %v247_v61 = vld [vmem:[%s2420_s1 + $0x240] sm:$0xff]  ;;  %v166_v63 = vld [vmem:[#allocation3 + $0xa8] sm:$0xff]  ;;  %v165_v1 = vld [vmem:[#allocation3 + $0xa0] sm:$0xff] }
  0x3a   :  { %1574 = vmatprep.subr.mxu0 %v249_v52  ;;  %341 = vmatprep.mubr.f32.mxu0 %v161_v54  ;;  %v246_v0 = vld [vmem:[%s2420_s1 + $0x238] sm:$0xff]  ;;  %v168_v2 = vld [vmem:[#allocation3 + $0xb8] sm:$0xff]  ;;  %v245_v3 = vld [vmem:[%s2420_s1 + $0x230] sm:$0xff] }
  0x3b   :  { %1575 = vmatpush3.msra.mxu0 %v249_v52  ;;  %436 = vmatprep.mubr.f32.mxu1 %v163_v60  ;;  %v167_v4 = vld [vmem:[#allocation3 + $0xb0] sm:$0xff]  ;;  %v244_v6 = vld [vmem:[%s2420_s1 + $0x228] sm:$0xff]  ;;  %v170_v8 = vld [vmem:[#allocation3 + $0xc8] sm:$0xff] }
  0x3c   :  { %1576 = vmatprep.subr.mxu0 %v248_v58  ;;  %342 = vmatmul.mubr.f32.gmra.mxu0 %v160_v59  ;;  %v171_v5 = vld [vmem:[#allocation3 + $0xd0] sm:$0xff]  ;;  %v173_v9 = vld [vmem:[#allocation3 + $0xe0] sm:$0xff]  ;;  %v172_v11 = vld [vmem:[#allocation3 + $0xd8] sm:$0xff] }
  0x3d   :  { %1577 = vmatpush3.msra.mxu0 %v248_v58  ;;  %437 = vmatmul.mubr.f32.gmra.mxu1 %v162_v62  ;;  %v243_v10 = vld [vmem:[%s2420_s1 + $0x220] sm:$0xff]  ;;  %v149_v12 = vld [vmem:[#allocation3 + $0x20] sm:$0xff]  ;;  %v242_v13 = vld [vmem:[%s2420_s1 + $0x218] sm:$0xff] }
  0x3e   :  { %1578 = vmatprep.subr.mxu0 %v247_v61  ;;  %346 = vmatprep.mubr.f32.mxu0 %v166_v63  ;;  %v241_v14 = vld [vmem:[%s2420_s1 + $0x210] sm:$0xff]  ;;  %v240_v15 = vld [vmem:[%s2420_s1 + $0x208] sm:$0xff]  ;;  %v239_v16 = vld [vmem:[%s2420_s1 + $0x200] sm:$0xff] }
  0x3f   :  { %1579 = vmatpush3.msra.mxu0 %v247_v61  ;;  %441 = vmatprep.mubr.f32.mxu1 %v168_v2  ;;  %v154_v17 = vld [vmem:[#allocation3 + $0x48] sm:$0xff]  ;;  %v159_v18 = vld [vmem:[#allocation3 + $0x70] sm:$0xff]  ;;  %v164_v19 = vld [vmem:[#allocation3 + $0x98] sm:$0xff] }
  0x40   :  { %1580 = vmatprep.subr.mxu0 %v246_v0  ;;  %347 = vmatmul.mubr.f32.gmra.mxu0 %v165_v1  ;;  %v169_v20 = vld [vmem:[#allocation3 + $0xc0] sm:$0xff]  ;;  %v174_v21 = vld [vmem:[#allocation3 + $0xe8] sm:$0xff]  ;;  %v678_v29 = vld [vmem:[%s2422_s3 + $0xe8] sm:$0xff] }
  0x41   :  { %1581 = vmatpush3.msra.mxu0 %v246_v0  ;;  %442 = vmatmul.mubr.f32.gmra.mxu1 %v167_v4  ;;  %v680_v22 = vld [vmem:[%s2422_s3 + $0xf8] sm:$0xff]  ;;  %v679_v25 = vld [vmem:[%s2422_s3 + $0xf0] sm:$0xff]  ;;  %v662_v31 = vld [vmem:[%s2422_s3 + $0x68] sm:$0xff] }
  0x42   :  { %1582 = vmatprep.subr.mxu0 %v245_v3  ;;  %351 = vmatprep.mubr.f32.mxu0 %v171_v5  ;;  %v664_v23 = vld [vmem:[%s2422_s3 + $0x78] sm:$0xff]  ;;  %v663_v27 = vld [vmem:[%s2422_s3 + $0x70] sm:$0xff]  ;;  %v710_v32 = vld [vmem:[%s2422_s3 + $0x1e8] sm:$0xff] }
  0x43   :  { %1583 = vmatpush3.msra.mxu0 %v245_v3  ;;  %446 = vmatprep.mubr.f32.mxu1 %v173_v9  ;;  %v712_v24 = vld [vmem:[%s2422_s3 + $0x1f8] sm:$0xff]  ;;  %v711_v28 = vld [vmem:[%s2422_s3 + $0x1f0] sm:$0xff]  ;;  %v677_v33 = vld [vmem:[%s2422_s3 + $0xe0] sm:$0xff] }
  0x44   :  { %1584 = vmatprep.subr.mxu0 %v244_v6  ;;  %352 = vmatmul.mubr.f32.gmra.mxu0 %v170_v8  ;;  %v696_v26 = vld [vmem:[%s2422_s3 + $0x178] sm:$0xff]  ;;  %v695_v30 = vld [vmem:[%s2422_s3 + $0x170] sm:$0xff]  ;;  %v694_v34 = vld [vmem:[%s2422_s3 + $0x168] sm:$0xff] }
  0x45   :  { %1585 = vmatpush3.msra.mxu0 %v244_v6  ;;  %447 = vmatmul.mubr.f32.gmra.mxu1 %v172_v11  ;;  %v661_v35 = vld [vmem:[%s2422_s3 + $0x60] sm:$0xff]  ;;  %v676_v37 = vld [vmem:[%s2422_s3 + $0xd8] sm:$0xff]  ;;  %v675_v41 = vld [vmem:[%s2422_s3 + $0xd0] sm:$0xff] }
  0x46   :  { %1586 = vmatprep.subr.mxu0 %v243_v10  ;;  %1596 = vmatprep.mubr.f32.mxu0 %v149_v12  ;;  %v709_v36 = vld [vmem:[%s2422_s3 + $0x1e0] sm:$0xff]  ;;  %v660_v39 = vld [vmem:[%s2422_s3 + $0x58] sm:$0xff]  ;;  %v659_v43 = vld [vmem:[%s2422_s3 + $0x50] sm:$0xff] }
  0x47   :  { %1587 = vmatpush3.msra.mxu0 %v243_v10  ;;  %1442 = vmatprep.subr.mxu1 %v680_v22  ;;  %v693_v38 = vld [vmem:[%s2422_s3 + $0x160] sm:$0xff]  ;;  %v708_v40 = vld [vmem:[%s2422_s3 + $0x1d8] sm:$0xff]  ;;  %v707_v44 = vld [vmem:[%s2422_s3 + $0x1d0] sm:$0xff] }
  0x48   :  { %1588 = vmatprep.subr.mxu0 %v242_v13  ;;  %1443 = vmatpush3.msra.mxu1 %v664_v23  ;;  %v692_v42 = vld [vmem:[%s2422_s3 + $0x158] sm:$0xff]  ;;  %v674_v45 = vld [vmem:[%s2422_s3 + $0xc8] sm:$0xff]  ;;  %v691_v46 = vld [vmem:[%s2422_s3 + $0x150] sm:$0xff] }
  0x49   :  { %1589 = vmatpush3.msra.mxu0 %v242_v13  ;;  %1444 = vmatprep.subr.mxu1 %v679_v25  ;;  %v658_v47 = vld [vmem:[%s2422_s3 + $0x48] sm:$0xff]  ;;  %v673_v49 = vld [vmem:[%s2422_s3 + $0xc0] sm:$0xff]  ;;  %v672_v53 = vld [vmem:[%s2422_s3 + $0xb8] sm:$0xff] }
  0x4a   :  { %1590 = vmatprep.subr.mxu0 %v241_v14  ;;  %1445 = vmatpush3.msra.mxu1 %v663_v27  ;;  %v706_v48 = vld [vmem:[%s2422_s3 + $0x1c8] sm:$0xff]  ;;  %v657_v51 = vld [vmem:[%s2422_s3 + $0x40] sm:$0xff]  ;;  %v656_v55 = vld [vmem:[%s2422_s3 + $0x38] sm:$0xff] }
  0x4b   :  { %1591 = vmatpush3.msra.mxu0 %v241_v14  ;;  %1446 = vmatprep.subr.mxu1 %v678_v29  ;;  %v690_v50 = vld [vmem:[%s2422_s3 + $0x148] sm:$0xff]  ;;  %v705_v52 = vld [vmem:[%s2422_s3 + $0x1c0] sm:$0xff]  ;;  %v704_v56 = vld [vmem:[%s2422_s3 + $0x1b8] sm:$0xff] }
  0x4c   :  { %1592 = vmatprep.subr.mxu0 %v240_v15  ;;  %1447 = vmatpush3.msra.mxu1 %v662_v31  ;;  %v689_v54 = vld [vmem:[%s2422_s3 + $0x140] sm:$0xff]  ;;  %v671_v57 = vld [vmem:[%s2422_s3 + $0xb0] sm:$0xff]  ;;  %v688_v58 = vld [vmem:[%s2422_s3 + $0x138] sm:$0xff] }
  0x4d   :  { %1593 = vmatpush3.msra.mxu0 %v240_v15  ;;  %1448 = vmatprep.subr.mxu1 %v677_v33  ;;  %v655_v59 = vld [vmem:[%s2422_s3 + $0x30] sm:$0xff]  ;;  %v670_v61 = vld [vmem:[%s2422_s3 + $0xa8] sm:$0xff]  ;;  %v669_v1 = vld [vmem:[%s2422_s3 + $0xa0] sm:$0xff] }
  0x4e   :  { %1594 = vmatprep.subr.mxu0 %v239_v16  ;;  %1449 = vmatpush3.msra.mxu1 %v661_v35  ;;  %v703_v60 = vld [vmem:[%s2422_s3 + $0x1b0] sm:$0xff]  ;;  %v654_v63 = vld [vmem:[%s2422_s3 + $0x28] sm:$0xff]  ;;  %v653_v3 = vld [vmem:[%s2422_s3 + $0x20] sm:$0xff] }
  0x4f   :  { %1595 = vmatpush3.msra.mxu0 %v239_v16  ;;  %1450 = vmatprep.subr.mxu1 %v676_v37  ;;  %v687_v62 = vld [vmem:[%s2422_s3 + $0x130] sm:$0xff]  ;;  %v702_v0 = vld [vmem:[%s2422_s3 + $0x1a8] sm:$0xff]  ;;  %v701_v4 = vld [vmem:[%s2422_s3 + $0x1a0] sm:$0xff] }
  0x50   :  { %1597 = vmatmul.mubr.f32.vlgmr.msra.gmra.mxu0 %v154_v17  ;;  %1492 = vmatprep.subr.mxu0 %v712_v24  ;;  %v686_v2 = vld [vmem:[%s2422_s3 + $0x128] sm:$0xff]  ;;  %v668_v5 = vld [vmem:[%s2422_s3 + $0x98] sm:$0xff]  ;;  %v685_v6 = vld [vmem:[%s2422_s3 + $0x120] sm:$0xff] }
  0x51   :  { %1599 = vmatprep.mubr.f32.mxu0 %v159_v18  ;;  %1493 = vmatpush3.msra.mxu0 %v696_v26  ;;  %v652_v8 = vld [vmem:[%s2422_s3 + $0x18] sm:$0xff]  ;;  %v667_v10 = vld [vmem:[%s2422_s3 + $0x90] sm:$0xff]  ;;  %v666_v14 = vld [vmem:[%s2422_s3 + $0x88] sm:$0xff] }
  0x52   :  { %1494 = vmatprep.subr.mxu0 %v711_v28  ;;  %1451 = vmatpush3.msra.mxu1 %v660_v39  ;;  %v700_v9 = vld [vmem:[%s2422_s3 + $0x198] sm:$0xff]  ;;  %v651_v12 = vld [vmem:[%s2422_s3 + $0x10] sm:$0xff]  ;;  %v650_v16 = vld [vmem:[%s2422_s3 + $0x8] sm:$0xff] }
  0x53   :  { %1495 = vmatpush3.msra.mxu0 %v695_v30  ;;  %1452 = vmatprep.subr.mxu1 %v675_v41  ;;  %v684_v11 = vld [vmem:[%s2422_s3 + $0x118] sm:$0xff]  ;;  %v699_v13 = vld [vmem:[%s2422_s3 + $0x190] sm:$0xff]  ;;  %v698_v17 = vld [vmem:[%s2422_s3 + $0x188] sm:$0xff] }
  0x54   :  { %1600 = vmatmul.mubr.f32.gmra.mxu0 %v164_v19  ;;  %1496 = vmatprep.subr.mxu0 %v710_v32  ;;  %v683_v15 = vld [vmem:[%s2422_s3 + $0x110] sm:$0xff]  ;;  %v665_v18 = vld [vmem:[%s2422_s3 + $0x80] sm:$0xff]  ;;  %v682_v19 = vld [vmem:[%s2422_s3 + $0x108] sm:$0xff] }
  0x55   :  { %1602 = vmatprep.mubr.f32.mxu0 %v169_v20  ;;  %1497 = vmatpush3.msra.mxu0 %v694_v34  ;;  %v649_v20 = vld [vmem:[%s2422_s3] sm:$0xff]  ;;  %v2280_v23 = vld [vmem:[%s2422_s3 + $0x278] sm:$0xff] }
  0x56   :  { %1498 = vmatprep.subr.mxu0 %v709_v36  ;;  %1453 = vmatpush3.msra.mxu1 %v659_v43  ;;  %v681_v22 = vld [vmem:[%s2422_s3 + $0x100] sm:$0xff] }
  0x57   :  { %1499 = vmatpush3.msra.mxu0 %v693_v38  ;;  %1454 = vmatprep.subr.mxu1 %v674_v45 }
  0x58   :  { %1603 = vmatmul.mubr.f32.gmra.mxu0 %v174_v21  ;;  %1500 = vmatprep.subr.mxu0 %v708_v40  ;;  %v697_v21 = vld [vmem:[%s2422_s3 + $0x180] sm:$0xff] }
  0x59   :  { %1501 = vmatpush3.msra.mxu0 %v692_v42  ;;  %1455 = vmatpush3.msra.mxu1 %v658_v47  ;;  %v1310_v47 = vld [vmem:[%s2421_s2] ss:$0 sm:$0xff] }
  0x5a   :  { %1502 = vmatprep.subr.mxu0 %v707_v44  ;;  %1456 = vmatprep.subr.mxu1 %v673_v49 }
  0x5b   :  { %1503 = vmatpush3.msra.mxu0 %v691_v46  ;;  %1457 = vmatpush3.msra.mxu1 %v657_v51 }
  0x5c   :  { %1504 = vmatprep.subr.mxu0 %v706_v48  ;;  %1458 = vmatprep.subr.mxu1 %v672_v53 }
  0x5d   :  { %1505 = vmatpush3.msra.mxu0 %v690_v50  ;;  %1459 = vmatpush3.msra.mxu1 %v656_v55 }
  0x5e   :  { %1506 = vmatprep.subr.mxu0 %v705_v52  ;;  %1460 = vmatprep.subr.mxu1 %v671_v57 }
  0x5f   :  { %1507 = vmatpush3.msra.mxu0 %v689_v54  ;;  %1461 = vmatpush3.msra.mxu1 %v655_v59 }
  0x60   :  { %1508 = vmatprep.subr.mxu0 %v704_v56  ;;  %1462 = vmatprep.subr.mxu1 %v670_v61 }
  0x61   :  { %1509 = vmatpush3.msra.mxu0 %v688_v58  ;;  %1463 = vmatpush3.msra.mxu1 %v654_v63 }
  0x62   :  { %1510 = vmatprep.subr.mxu0 %v703_v60  ;;  %1464 = vmatprep.subr.mxu1 %v669_v1 }
  0x63   :  { %1511 = vmatpush3.msra.mxu0 %v687_v62  ;;  %1465 = vmatpush3.msra.mxu1 %v653_v3 }
  0x64   :  { %1512 = vmatprep.subr.mxu0 %v702_v0  ;;  %1466 = vmatprep.subr.mxu1 %v668_v5 }
  0x65   :  { %1513 = vmatpush3.msra.mxu0 %v686_v2  ;;  %1467 = vmatpush3.msra.mxu1 %v652_v8 }
  0x66   :  { %1514 = vmatprep.subr.mxu0 %v701_v4  ;;  %1468 = vmatprep.subr.mxu1 %v667_v10 }
  0x67   :  { %1515 = vmatpush3.msra.mxu0 %v685_v6  ;;  %1469 = vmatpush3.msra.mxu1 %v651_v12 }
  0x68   :  { %1516 = vmatprep.subr.mxu0 %v700_v9  ;;  %1470 = vmatprep.subr.mxu1 %v666_v14 }
  0x69   :  { %1517 = vmatpush3.msra.mxu0 %v684_v11  ;;  %1471 = vmatpush3.msra.mxu1 %v650_v16 }
  0x6a   :  { %1518 = vmatprep.subr.mxu0 %v699_v13  ;;  %1472 = vmatprep.subr.mxu1 %v665_v18 }
  0x6b   :  { %1519 = vmatpush3.msra.mxu0 %v683_v15  ;;  %1473 = vmatpush3.msra.mxu1 %v649_v20 }
  0x6c   :  { %1520 = vmatprep.subr.mxu0 %v698_v17  ;;  %1605 = vmatprep.subr.mxu1 %v2280_v23 }
  0x6d   :  { %1521 = vmatpush3.msra.mxu0 %v682_v19 }
  0x6e   :  { %1522 = vmatprep.subr.mxu0 %v697_v21 }
  0x6f   :  { %1523 = vmatpush3.msra.mxu0 %v681_v22 }
  0xf0   :  { %v1352_v24 = vpop.f32.mrf.mxu0 }
  0xf1   :  { %v1402_v26 = vpop.f32.mrf.mxu1 }
  0xf2   :  { %v1353_v25 = vpop.f32.mrf.mxu0 }
  0xf3   :  { %v1403_v27 = vpop.f32.mrf.mxu1  ;;  %v1354_v46 = vadd.f32 %v1353_v25, %v1352_v24 }
  0xf4   :  { %v1355_v28 = vpop.f32.mrf.mxu0  ;;  %v1404_v55 = vadd.f32 %v1403_v27, %v1402_v26 }
  0xf5   :  { %v1405_v30 = vpop.f32.mrf.mxu1  ;;  %v329_v54 = vadd.f32 %v1354_v46, %v1310_v47 }
  0xf6   :  { %v1356_v29 = vpop.f32.mrf.mxu0 }
  0xf7   :  { %v1406_v32 = vpop.f32.mrf.mxu1  ;;  %v1357_v43 = vadd.f32 %v1356_v29, %v1355_v28  ;;  %v424_v2 = vadd.f32 %v1404_v55, %v329_v54  ;;  %v727_v54 = vld [vmem:[%s2422_s3 + $0x270] sm:$0xff] }
  0xf8   :  { %v1358_v31 = vpop.f32.mrf.mxu0  ;;  %v1407_v50 = vadd.f32 %v1406_v32, %v1405_v30 }
  0xf9   :  { %v1408_v34 = vpop.f32.mrf.mxu1  ;;  %v334_v49 = vadd.f32 %v1357_v43, %v1310_v47 }
  0xfa   :  { %v1359_v33 = vpop.f32.mrf.mxu0 }
  0xfb   :  { %v1409_v36 = vpop.f32.mrf.mxu1  ;;  %v1360_v51 = vadd.f32 %v1359_v33, %v1358_v31  ;;  %v429_v59 = vadd.f32 %v1407_v50, %v334_v49 }
  0xfc   :  { %v1361_v35 = vpop.f32.mrf.mxu0  ;;  %v1410_v61 = vadd.f32 %v1409_v36, %v1408_v34 }
  0xfd   :  { %v1411_v38 = vpop.f32.mrf.mxu1  ;;  %v339_v60 = vadd.f32 %v1360_v51, %v1310_v47 }
  0xfe   :  { %v1362_v37 = vpop.f32.mrf.mxu0 }
  0xff   :  { %v1412_v40 = vpop.f32.mrf.mxu1  ;;  %v1363_v48 = vadd.f32 %v1362_v37, %v1361_v35  ;;  %v434_v11 = vadd.f32 %v1410_v61, %v339_v60 }
 0x100   :  { %v1364_v39 = vpop.f32.mrf.mxu0  ;;  %v1413_v57 = vadd.f32 %v1412_v40, %v1411_v38 }
 0x101   :  { %v1414_v42 = vpop.f32.mrf.mxu1  ;;  %v344_v56 = vadd.f32 %v1363_v48, %v1310_v47 }
 0x102   :  { %v1365_v41 = vpop.f32.mrf.mxu0 }
 0x103   :  { %v1415_v45 = vpop.f32.mrf.mxu1  ;;  %v1366_v0 = vadd.f32 %v1365_v41, %v1364_v39  ;;  %v439_v4 = vadd.f32 %v1413_v57, %v344_v56  ;;  %v726_v57 = vld [vmem:[%s2422_s3 + $0x268] sm:$0xff] }
 0x104   :  { %v1367_v44 = vpop.f32.mrf.mxu0  ;;  %v1416_v13 = vadd.f32 %v1415_v45, %v1414_v42 }
 0x105   :  { %v1417_v53 = vpop.f32.mrf.mxu1  ;;  %v349_v12 = vadd.f32 %v1366_v0, %v1310_v47 }
 0x106   :  { %v1368_v52 = vpop.f32.mrf.mxu0 }
 0x107   :  { %v1369_v58 = vadd.f32 %v1368_v52, %v1367_v44  ;;  %v1418_v62 = vpop.f32.mrf.mxu1  ;;  %v444_v24 = vadd.f32 %v1416_v13, %v349_v12 }
 0x108   :  { %v1419_v6 = vadd.f32 %v1418_v62, %v1417_v53 }
 0x109   :  { %v354_v5 = vadd.f32 %v1369_v58, %v1310_v47 }
 0x10b   :  { %v449_v19 = vadd.f32 %v1419_v6, %v354_v5  ;;  %v724_v5 = vld [vmem:[%s2422_s3 + $0x258] sm:$0xff] }
 0x110   :  { %v1598_v63 = vpop.f32.mrf.mxu0 }
 0x111   :  { %v524_v1 = vadd.f32 %v1598_v63, %v429_v59 }
 0x112   :  { %v518_v3 = vpop.f32.mrf.mxu0 }
 0x113   :  { %v548_v8 = vmax.f32 %v524_v1, 0.0  ;;  %v519_v9 = vadd.f32 %v518_v3, %v424_v2 }
 0x114   :  { %v1601_v10 = vpop.f32.mrf.mxu0 }
 0x115   :  { %554 = vst.msk [vmem:[#allocation2 + $0x10] sm:$0xff] %vm29_vm0, %v548_v8  ;;  %v547_v14 = vmax.f32 %v519_v9, 0.0  ;;  %v534_v15 = vadd.f32 %v1601_v10, %v439_v4 }
 0x116   :  { %v528_v16 = vpop.f32.mrf.mxu0 }
 0x117   :  { %553 = vst.msk [vmem:[#allocation2 + $0x8] sm:$0xff] %vm29_vm0, %v547_v14  ;;  %v550_v17 = vmax.f32 %v534_v15, 0.0  ;;  %v529_v18 = vadd.f32 %v528_v16, %v434_v11  ;;  %v723_v11 = vld [vmem:[%s2422_s3 + $0x250] sm:$0xff]  ;;  %v722_v14 = vld [vmem:[%s2422_s3 + $0x248] sm:$0xff] }
 0x118   :  { %v1604_v20 = vpop.f32.mrf.mxu0 }
 0x119   :  { %556 = vst.msk [vmem:[#allocation2 + $0x30] sm:$0xff] %vm29_vm0, %v550_v17  ;;  %v549_v21 = vmax.f32 %v529_v18, 0.0  ;;  %v544_v22 = vadd.f32 %v1604_v20, %v449_v19  ;;  %v721_v17 = vld [vmem:[%s2422_s3 + $0x240] sm:$0xff]  ;;  %v720_v20 = vld [vmem:[%s2422_s3 + $0x238] sm:$0xff] }
 0x11a   :  { %v538_v25 = vpop.f32.mrf.mxu0 }
 0x11b   :  { %555 = vst.msk [vmem:[#allocation2 + $0x18] sm:$0xff] %vm29_vm0, %v549_v21  ;;  %v552_v26 = vmax.f32 %v544_v22, 0.0  ;;  %v539_v27 = vadd.f32 %v538_v25, %v444_v24  ;;  %v719_v24 = vld [vmem:[%s2422_s3 + $0x230] sm:$0xff] }
 0x11c   :  { %v572_v28 = vld [vmem:[#allocation2 + $0x10] sm:$0xff] }
 0x11d   :  { %558 = vst.msk [vmem:[#allocation2 + $0x40] sm:$0xff] %vm29_vm0, %v552_v26  ;;  %v551_v29 = vmax.f32 %v539_v27, 0.0  ;;  %575 = vst.msk [vmem:[#allocation3 + $0x38] sm:$0xff] %vm29_vm0, %v572_v28  ;;  %v718_v27 = vld [vmem:[%s2422_s3 + $0x228] sm:$0xff] }
 0x11e   :  { %v565_v30 = vld [vmem:[#allocation2 + $0x7] sm:$0xff]  ;;  %v566_v34 = vld [vmem:[#allocation2 + $0xf] sm:$0xff] }
 0x11f   :  { %v577_v31 = vld [vmem:[#allocation2 + $0x9] sm:$0xff]  ;;  %557 = vst.msk [vmem:[#allocation2 + $0x38] sm:$0xff] %vm29_vm0, %v551_v29  ;;  %568 = vst.msk [vmem:[#allocation3 + $0x8] sm:$0xff] %vm29_vm0, %v565_v30  ;;  %v717_v29 = vld [vmem:[%s2422_s3 + $0x220] sm:$0xff] }
 0x120   :  { %v559_v32 = vld [vmem:[#allocation2 + $0x6] sm:$0xff]  ;;  %580 = vst.msk [vmem:[#allocation3 + $0x18] sm:$0xff] %vm29_vm0, %v577_v31  ;;  %v560_v35 = vld [vmem:[#allocation2 + $0xe] sm:$0xff]  ;;  %569 = vst.msk [vmem:[#allocation3 + $0x30] sm:$0xff] %vm29_vm0, %v566_v34 }
 0x121   :  { %562 = vst.msk [vmem:[#allocation3] sm:$0xff] %vm29_vm0, %v559_v32  ;;  %v571_v33 = vld [vmem:[#allocation2 + $0x8] sm:$0xff]  ;;  %563 = vst.msk [vmem:[#allocation3 + $0x28] sm:$0xff] %vm29_vm0, %v560_v35  ;;  %v601_v38 = vld [vmem:[#allocation2 + $0x30] sm:$0xff] }
 0x122   :  { %574 = vst.msk [vmem:[#allocation3 + $0x10] sm:$0xff] %vm29_vm0, %v571_v33  ;;  %v595_v36 = vld [vmem:[#allocation2 + $0x2f] sm:$0xff]  ;;  %604 = vst.msk [vmem:[#allocation3 + $0x88] sm:$0xff] %vm29_vm0, %v601_v38  ;;  %v567_v41 = vld [vmem:[#allocation2 + $0x17] sm:$0xff] }
 0x123   :  { %v589_v37 = vld [vmem:[#allocation2 + $0x2e] sm:$0xff]  ;;  %598 = vst.msk [vmem:[#allocation3 + $0x80] sm:$0xff] %vm29_vm0, %v595_v36  ;;  %v579_v42 = vld [vmem:[#allocation2 + $0x19] sm:$0xff]  ;;  %570 = vst.msk [vmem:[#allocation3 + $0x58] sm:$0xff] %vm29_vm0, %v567_v41  ;;  %v1698_v41 = vmov 0  }
 0x124   :  { %592 = vst.msk [vmem:[#allocation3 + $0x78] sm:$0xff] %vm29_vm0, %v589_v37  ;;  %v583_v39 = vld [vmem:[#allocation2 + $0xa] sm:$0xff]  ;;  %582 = vst.msk [vmem:[#allocation3 + $0x68] sm:$0xff] %vm29_vm0, %v579_v42  ;;  %v561_v43 = vld [vmem:[#allocation2 + $0x16] sm:$0xff]  ;;  %1649 = vset.pattern.permute.xlu0 %v1698_v41  ;;  %1650 = vset.pattern.permute.xlu1 %v1698_v41 }
 0x125   :  { %v578_v40 = vld [vmem:[#allocation2 + $0x11] sm:$0xff]  ;;  %586 = vst.msk [vmem:[#allocation3 + $0x20] sm:$0xff] %vm29_vm0, %v583_v39  ;;  %564 = vst.msk [vmem:[#allocation3 + $0x50] sm:$0xff] %vm29_vm0, %v561_v43  ;;  %v609_v46 = vld [vmem:[#allocation2 + $0x41] sm:$0xff] }
 0x126   :  { %581 = vst.msk [vmem:[#allocation3 + $0x40] sm:$0xff] %vm29_vm0, %v578_v40  ;;  %v573_v44 = vld [vmem:[#allocation2 + $0x18] sm:$0xff]  ;;  %v603_v47 = vld [vmem:[#allocation2 + $0x40] sm:$0xff]  ;;  %612 = vst.msk [vmem:[#allocation3 + $0xe0] sm:$0xff] %vm29_vm0, %v609_v46 }
 0x127   :  { %v584_v45 = vld [vmem:[#allocation2 + $0x12] sm:$0xff]  ;;  %576 = vst.msk [vmem:[#allocation3 + $0x60] sm:$0xff] %vm29_vm0, %v573_v44  ;;  %606 = vst.msk [vmem:[#allocation3 + $0xd8] sm:$0xff] %vm29_vm0, %v603_v47  ;;  %v585_v48 = vld [vmem:[#allocation2 + $0x1a] sm:$0xff] }
 0x128   :  { %587 = vst.msk [vmem:[#allocation3 + $0x48] sm:$0xff] %vm29_vm0, %v584_v45  ;;  %v615_v49 = vld [vmem:[#allocation2 + $0x42] sm:$0xff]  ;;  %v620_v50 = vld [vmem:[#allocation3 + $0x8] sm:$0xff]  ;;  %v619_v52 = vld [vmem:[#allocation3] sm:$0xff] }
 0x129   :  { %v622_v51 = vld [vmem:[#allocation3 + $0x18] sm:$0xff]  ;;  %588 = vst.msk [vmem:[#allocation3 + $0x70] sm:$0xff] %vm29_vm0, %v585_v48  ;;  %618 = vst.msk [vmem:[#allocation3 + $0xe8] sm:$0xff] %vm29_vm0, %v615_v49  ;;  %800 = vmatprep.mubr.f32.mxu1 %v620_v50  ;;  %v621_v53 = vld [vmem:[#allocation3 + $0x10] sm:$0xff] }
 0x12a   :  { %895 = vmatprep.mubr.f32.mxu0 %v622_v51  ;;  %801 = vmatmul.mubr.f32.vlgmr.msra.gmra.mxu1 %v619_v52  ;;  %v625_v55 = vld [vmem:[#allocation3 + $0x30] sm:$0xff]  ;;  %v607_v56 = vld [vmem:[#allocation2 + $0x31] sm:$0xff]  ;;  %v626_v63 = vld [vmem:[#allocation3 + $0x38] sm:$0xff] }
 0x12b   :  { %896 = vmatmul.mubr.f32.vlgmr.msra.gmra.mxu0 %v621_v53  ;;  %1606 = vmatpush3.msra.mxu1 %v2280_v23  ;;  %610 = vst.msk [vmem:[#allocation3 + $0x90] sm:$0xff] %vm29_vm0, %v607_v56  ;;  %v596_v58 = vld [vmem:[#allocation2 + $0x37] sm:$0xff]  ;;  %v725_v23 = vld [vmem:[%s2422_s3 + $0x260] sm:$0xff]  ;;  %v630_v2 = vld [vmem:[#allocation3 + $0x58] sm:$0xff] }
 0x12c   :  { %805 = vmatprep.mubr.f32.mxu1 %v625_v55  ;;  %v608_v59 = vld [vmem:[#allocation2 + $0x39] sm:$0xff]  ;;  %1607 = vmatprep.subr.mxu1 %v727_v54  ;;  %599 = vst.msk [vmem:[#allocation3 + $0xa8] sm:$0xff] %vm29_vm0, %v596_v58  ;;  %v635_v12 = vld [vmem:[#allocation3 + $0x80] sm:$0xff]  ;;  %v634_v15 = vld [vmem:[#allocation3 + $0x78] sm:$0xff] }
 0x12d   :  { %v627_v60 = vld [vmem:[#allocation3 + $0x40] sm:$0xff]  ;;  %611 = vst.msk [vmem:[#allocation3 + $0xb8] sm:$0xff] %vm29_vm0, %v608_v59  ;;  %1608 = vmatpush3.msra.mxu1 %v727_v54  ;;  %v624_v61 = vld [vmem:[#allocation3 + $0x28] sm:$0xff]  ;;  %v629_v9 = vld [vmem:[#allocation3 + $0x50] sm:$0xff] }
 0x12e   :  { %900 = vmatprep.mubr.f32.mxu0 %v627_v60  ;;  %v590_v62 = vld [vmem:[#allocation2 + $0x36] sm:$0xff]  ;;  %1609 = vmatprep.subr.mxu1 %v726_v57  ;;  %v597_v1 = vld [vmem:[#allocation2 + $0x3f] sm:$0xff]  ;;  %v646_v30 = vld [vmem:[#allocation3 + $0xd8] sm:$0xff] }
 0x12f   :  { %806 = vmatmul.mubr.f32.gmra.mxu1 %v624_v61  ;;  %593 = vst.msk [vmem:[#allocation3 + $0xa0] sm:$0xff] %vm29_vm0, %v590_v62  ;;  %v602_v0 = vld [vmem:[#allocation2 + $0x38] sm:$0xff]  ;;  %901 = vmatmul.mubr.f32.gmra.mxu0 %v626_v63  ;;  %600 = vst.msk [vmem:[#allocation3 + $0xd0] sm:$0xff] %vm29_vm0, %v597_v1  ;;  %v631_v10 = vld [vmem:[#allocation3 + $0x60] sm:$0xff] }
 0x130   :  { %1610 = vmatpush3.msra.mxu1 %v726_v57  ;;  %v632_v3 = vld [vmem:[#allocation3 + $0x68] sm:$0xff]  ;;  %605 = vst.msk [vmem:[#allocation3 + $0xb0] sm:$0xff] %vm29_vm0, %v602_v0  ;;  %810 = vmatprep.mubr.f32.mxu1 %v630_v2  ;;  %v647_v26 = vld [vmem:[#allocation3 + $0xe0] sm:$0xff]  ;;  %v714_v34 = vld [vmem:[%s2422_s3 + $0x208] sm:$0xff] }
 0x131   :  { %v591_v4 = vld [vmem:[#allocation2 + $0x3e] sm:$0xff]  ;;  %905 = vmatprep.mubr.f32.mxu0 %v632_v3  ;;  %v613_v6 = vld [vmem:[#allocation2 + $0x32] sm:$0xff]  ;;  %1611 = vmatprep.subr.mxu1 %v725_v23 }
 0x132   :  { %594 = vst.msk [vmem:[#allocation3 + $0xc8] sm:$0xff] %vm29_vm0, %v591_v4  ;;  %616 = vst.msk [vmem:[#allocation3 + $0x98] sm:$0xff] %vm29_vm0, %v613_v6  ;;  %v614_v8 = vld [vmem:[#allocation2 + $0x3a] sm:$0xff]  ;;  %1612 = vmatpush3.msra.mxu1 %v725_v23  ;;  %v623_v31 = vld [vmem:[#allocation3 + $0x20] sm:$0xff] }
 0x133   :  { %617 = vst.msk [vmem:[#allocation3 + $0xc0] sm:$0xff] %vm29_vm0, %v614_v8  ;;  %1613 = vmatprep.subr.mxu1 %v724_v5  ;;  %811 = vmatmul.mubr.f32.gmra.mxu1 %v629_v9  ;;  %v637_v13 = vld [vmem:[#allocation3 + $0x90] sm:$0xff]  ;;  %v636_v16 = vld [vmem:[#allocation3 + $0x88] sm:$0xff]  ;;  %v715_v33 = vld [vmem:[%s2422_s3 + $0x210] sm:$0xff] }
 0x134   :  { %906 = vmatmul.mubr.f32.gmra.mxu0 %v631_v10  ;;  %1614 = vmatpush3.msra.mxu1 %v724_v5  ;;  %v640_v18 = vld [vmem:[#allocation3 + $0xa8] sm:$0xff]  ;;  %v642_v19 = vld [vmem:[#allocation3 + $0xb8] sm:$0xff]  ;;  %v713_v35 = vld [vmem:[%s2422_s3 + $0x200] sm:$0xff]  ;;  %v1051_v5 = vlaneseq }
 0x135   :  { %815 = vmatprep.mubr.f32.mxu1 %v635_v12  ;;  %910 = vmatprep.mubr.f32.mxu0 %v637_v13  ;;  %v716_v32 = vld [vmem:[%s2422_s3 + $0x218] sm:$0xff]  ;;  %v633_v37 = vld [vmem:[#allocation3 + $0x70] sm:$0xff] }
 0x136   :  { %1615 = vmatprep.subr.mxu1 %v723_v11  ;;  %v639_v21 = vld [vmem:[#allocation3 + $0xa0] sm:$0xff]  ;;  %v645_v25 = vld [vmem:[#allocation3 + $0xd0] sm:$0xff]  ;;  %v628_v36 = vld [vmem:[#allocation3 + $0x48] sm:$0xff] }
 0x137   :  { %1616 = vmatpush3.msra.mxu1 %v723_v11  ;;  %v641_v22 = vld [vmem:[#allocation3 + $0xb0] sm:$0xff]  ;;  %v648_v40 = vld [vmem:[#allocation3 + $0xe8] sm:$0xff] }
 0x138   :  { %1617 = vmatprep.subr.mxu1 %v722_v14  ;;  %816 = vmatmul.mubr.f32.gmra.mxu1 %v634_v15  ;;  %v1311_v63 = vld [vmem:[%s2423_s4] ss:$0 sm:$0xff] }
 0x139   :  { %911 = vmatmul.mubr.f32.gmra.mxu0 %v636_v16  ;;  %1618 = vmatpush3.msra.mxu1 %v722_v14  ;;  %v644_v28 = vld [vmem:[#allocation3 + $0xc8] sm:$0xff]  ;;  %v638_v38 = vld [vmem:[#allocation3 + $0x98] sm:$0xff]  ;;  %v2372_v16 = vshrl.u32 %v1051_v5, 7 }
 0x13a   :  { %820 = vmatprep.mubr.f32.mxu1 %v640_v18  ;;  %915 = vmatprep.mubr.f32.mxu0 %v642_v19  ;;  %v643_v39 = vld [vmem:[#allocation3 + $0xc0] sm:$0xff] }
 0x13b   :  { %1619 = vmatprep.subr.mxu1 %v721_v17 }
 0x13c   :  { %1620 = vmatpush3.msra.mxu1 %v721_v17 }
 0x13d   :  { %1621 = vmatprep.subr.mxu1 %v720_v20  ;;  %821 = vmatmul.mubr.f32.gmra.mxu1 %v639_v21 }
 0x13e   :  { %916 = vmatmul.mubr.f32.gmra.mxu0 %v641_v22  ;;  %1622 = vmatpush3.msra.mxu1 %v720_v20 }
 0x13f   :  { %825 = vmatprep.mubr.f32.mxu1 %v645_v25  ;;  %920 = vmatprep.mubr.f32.mxu0 %v647_v26 }
 0x140   :  { %1623 = vmatprep.subr.mxu1 %v719_v24 }
 0x141   :  { %1624 = vmatpush3.msra.mxu1 %v719_v24 }
 0x142   :  { %1625 = vmatprep.subr.mxu1 %v718_v27  ;;  %826 = vmatmul.mubr.f32.gmra.mxu1 %v644_v28 }
 0x143   :  { %921 = vmatmul.mubr.f32.gmra.mxu0 %v646_v30  ;;  %1626 = vmatpush3.msra.mxu1 %v718_v27 }
 0x144   :  { %1627 = vmatprep.subr.mxu1 %v717_v29  ;;  %1637 = vmatprep.mubr.f32.mxu1 %v623_v31  ;;  %v1093_v31 = vsub.s32 1, %v2372_v16 }
 0x145   :  { %1628 = vmatpush3.msra.mxu1 %v717_v29 }
 0x146   :  { %1629 = vmatprep.subr.mxu1 %v716_v32 }
 0x147   :  { %1630 = vmatpush3.msra.mxu1 %v716_v32 }
 0x148   :  { %1631 = vmatprep.subr.mxu1 %v715_v33 }
 0x149   :  { %1632 = vmatpush3.msra.mxu1 %v715_v33 }
 0x14a   :  { %1633 = vmatprep.subr.mxu1 %v714_v34 }
 0x14b   :  { %1634 = vmatpush3.msra.mxu1 %v714_v34 }
 0x14c   :  { %1635 = vmatprep.subr.mxu1 %v713_v35 }
 0x14d   :  { %1636 = vmatpush3.msra.mxu1 %v713_v35 }
 0x14e   :  { %1638 = vmatmul.mubr.f32.vlgmr.msra.gmra.mxu1 %v628_v36 }
 0x14f   :  { %1640 = vmatprep.mubr.f32.mxu1 %v633_v37  ;;  %v1033_v37 = vld [vmem:[%s2424_s5] sm:$0x7]  ;;  %s1699_s5 = smov [#allocation5]  }
 0x150   :  { %s1302_s10 = sshll.u32 %s1699_s5, 4  ;;  %s1303_s10 = int_to_ptr.vmem [resolvable:$true] %s1302_s10 }
 0x151   :  { %s1675_s6 = scalar_lea.vmem %s1303_s10, 32  ;;  %p1680_p1 = scmp.lt.s32.totalorder %s1303_s10, %s1303_s10 }
 0x152   :  { %1641 = vmatmul.mubr.f32.gmra.mxu1 %v638_v38  ;;  %v1053_v38 = vsub.s32 0, %v2372_v16  ;;  %p1676_p0 = scmp.ne.s32.totalorder %s1303_s10, %s1675_s6  ;;  %p1681_p2 = scmp.lt.s32.totalorder %s1675_s6, %s1675_s6 }
 0x153   :  { %1643 = vmatprep.mubr.f32.mxu1 %v643_v39 }
 0x154   :  { %p1682_p3 = por %p1681_p2, %p1680_p1 }
 0x156   :  { %1644 = vmatmul.mubr.f32.gmra.mxu1 %v648_v40  ;;  %p1683_p4 = pnand %p1682_p3, %p1676_p0 }
 0x1ea   :  { %v1474_v42 = vpop.f32.mrf.mxu1 }
 0x1eb   :  { %v1524_v43 = vpop.f32.mrf.mxu0 }
 0x1ec   :  { %v1475_v44 = vpop.f32.mrf.mxu1 }
 0x1ed   :  { %v1525_v45 = vpop.f32.mrf.mxu0  ;;  %v1476_v62 = vadd.f32 %v1475_v44, %v1474_v42 }
 0x1ee   :  { %v1526_v10 = vadd.f32 %v1525_v45, %v1524_v43 }
 0x1ef   :  { %v1477_v46 = vpop.f32.mrf.mxu1  ;;  %v1527_v47 = vpop.f32.mrf.mxu0  ;;  %v803_v6 = vadd.f32 %v1476_v62, %v1311_v63 }
 0x1f1   :  { %v1478_v48 = vpop.f32.mrf.mxu1  ;;  %v1528_v49 = vpop.f32.mrf.mxu0  ;;  %v898_v20 = vadd.f32 %v1526_v10, %v803_v6 }
 0x1f2   :  { %v1479_v61 = vadd.f32 %v1478_v48, %v1477_v46  ;;  %v1529_v8 = vadd.f32 %v1528_v49, %v1527_v47  ;;  %v1094_v47 = vrot.slane %v1033_v37, %v1093_v31 }
 0x1f3   :  { %v1480_v50 = vpop.f32.mrf.mxu1 }
 0x1f4   :  { %v1530_v51 = vpop.f32.mrf.mxu0  ;;  %v808_v1 = vadd.f32 %v1479_v61, %v1311_v63 }
 0x1f5   :  { %v1481_v52 = vpop.f32.mrf.mxu1 }
 0x1f6   :  { %v1531_v53 = vpop.f32.mrf.mxu0  ;;  %v1482_v3 = vadd.f32 %v1481_v52, %v1480_v50  ;;  %v903_v13 = vadd.f32 %v1529_v8, %v808_v1 }
 0x1f7   :  { %v1532_v21 = vadd.f32 %v1531_v53, %v1530_v51  ;;  %v1054_v51 = vrot.slane %v1033_v37, %v1053_v38 }
 0x1f8   :  { %v1483_v54 = vpop.f32.mrf.mxu1  ;;  %v813_v14 = vadd.f32 %v1482_v3, %v1311_v63 }
 0x1f9   :  { %v1533_v56 = vpop.f32.mrf.mxu0 }
 0x1fa   :  { %v1484_v55 = vpop.f32.mrf.mxu1  ;;  %v908_v30 = vadd.f32 %v1532_v21, %v813_v14 }
 0x1fb   :  { %v1534_v58 = vpop.f32.mrf.mxu0  ;;  %v1485_v2 = vadd.f32 %v1484_v55, %v1483_v54  ;;  %v1133_v55 = vsub.s32 2, %v2372_v16 }
 0x1fc   :  { %v1535_v17 = vadd.f32 %v1534_v58, %v1533_v56 }
 0x1fd   :  { %v1486_v57 = vpop.f32.mrf.mxu1  ;;  %v818_v11 = vadd.f32 %v1485_v2, %v1311_v63 }
 0x1fe   :  { %v1536_v60 = vpop.f32.mrf.mxu0 }
 0x1ff   :  { %v1487_v59 = vpop.f32.mrf.mxu1  ;;  %v913_v28 = vadd.f32 %v1535_v17, %v818_v11 }
 0x200   :  { %v1537_v0 = vpop.f32.mrf.mxu0  ;;  %v1488_v18 = vadd.f32 %v1487_v59, %v1486_v57 }
 0x201   :  { %v1538_v39 = vadd.f32 %v1537_v0, %v1536_v60 }
 0x202   :  { %v1489_v23 = vpop.f32.mrf.mxu1  ;;  %v823_v32 = vadd.f32 %v1488_v18, %v1311_v63 }
 0x203   :  { %v1539_v9 = vpop.f32.mrf.mxu0 }
 0x204   :  { %v1490_v4 = vpop.f32.mrf.mxu1  ;;  %v918_v46 = vadd.f32 %v1538_v39, %v823_v32 }
 0x205   :  { %v1491_v12 = vadd.f32 %v1490_v4, %v1489_v23  ;;  %v1540_v22 = vpop.f32.mrf.mxu0 }
 0x206   :  { %v1541_v33 = vadd.f32 %v1540_v22, %v1539_v9 }
 0x207   :  { %v828_v25 = vadd.f32 %v1491_v12, %v1311_v63  ;;  %v1134_v63 = vrot.slane %v1033_v37, %v1133_v55 }
 0x209   :  { %v923_v42 = vadd.f32 %v1541_v33, %v828_v25 }
 0x20e   :  { %v1639_v15 = vpop.f32.mrf.mxu1 }
 0x20f   :  { %v998_v19 = vadd.f32 %v1639_v15, %v903_v13 }
 0x210   :  { %v992_v24 = vpop.f32.mrf.mxu1 }
 0x211   :  { %v1022_v26 = vmax.f32 %v998_v19, 0.0  ;;  %v993_v27 = vadd.f32 %v992_v24, %v898_v20 }
 0x212   :  { %v1642_v29 = vpop.f32.mrf.mxu1 }
 0x213   :  { %1028 = vst.msk [vmem:[#allocation2 + $0x10] sm:$0xff] %vm29_vm0, %v1022_v26  ;;  %v1021_v34 = vmax.f32 %v993_v27, 0.0  ;;  %v1008_v35 = vadd.f32 %v1642_v29, %v913_v28 }
 0x214   :  { %v1002_v36 = vpop.f32.mrf.mxu1 }
 0x215   :  { %1027 = vst.msk [vmem:[#allocation2 + $0x8] sm:$0xff] %vm29_vm0, %v1021_v34  ;;  %v1024_v40 = vmax.f32 %v1008_v35, 0.0  ;;  %v1003_v41 = vadd.f32 %v1002_v36, %v908_v30 }
 0x216   :  { %v1645_v43 = vpop.f32.mrf.mxu1 }
 0x217   :  { %1030 = vst.msk [vmem:[#allocation2 + $0x30] sm:$0xff] %vm29_vm0, %v1024_v40  ;;  %v1023_v44 = vmax.f32 %v1003_v41, 0.0  ;;  %v1018_v45 = vadd.f32 %v1645_v43, %v923_v42 }
 0x218   :  { %v1012_v48 = vpop.f32.mrf.mxu1 }
 0x219   :  { %1029 = vst.msk [vmem:[#allocation2 + $0x18] sm:$0xff] %vm29_vm0, %v1023_v44  ;;  %v1026_v49 = vmax.f32 %v1018_v45, 0.0  ;;  %v1013_v50 = vadd.f32 %v1012_v48, %v918_v46  ;;  %v2405_v48 = vand.u32 127, %v1051_v5 }
 0x21a   :  { %v1086_v52 = vld [vmem:[#allocation2 + $0x10] sm:$0xff] }
 0x21b   :  { %1032 = vst.msk [vmem:[#allocation2 + $0x40] sm:$0xff] %vm29_vm0, %v1026_v49  ;;  %v1025_v53 = vmax.f32 %v1013_v50, 0.0  ;;  %v1096_v54 = vmul.f32 %v1094_v47, %v1086_v52  ;;  %vm1167_vm3 = vcmp.ge.s32.totalorder %v2405_v48, 6  ;;  %vm1168_vm4 = vcmp.lt.s32.totalorder %v2405_v48, 21  ;;  %v1312_v50 = vld [vmem:[#allocation4] ss:$0 sm:$0xff] }
 0x21c   :  { %v1045_v56 = vld [vmem:[#allocation2 + $0x7] sm:$0xff]  ;;  %v1046_v57 = vld [vmem:[#allocation2 + $0xf] sm:$0xff]  ;;  %vm1169_vm5 = vmand %vm1167_vm3, %vm1168_vm4 }
 0x21d   :  { %1031 = vst.msk [vmem:[#allocation2 + $0x38] sm:$0xff] %vm29_vm0, %v1025_v53  ;;  %v1104_v58 = vsel %vm29_vm0, %v1096_v54, 0.0  ;;  %v1055_v59 = vmul.f32 %v1054_v51, %v1045_v56  ;;  %v1056_v62 = vmul.f32 %v1054_v51, %v1046_v57  ;;  %v1085_v1 = vld [vmem:[#allocation2 + $0x8] sm:$0xff]  ;;  %v1313_v49 = vsel %vm1169_vm5, 1.0, %v1697_v7 }
 0x21e   :  { %1105 = vadd.xlane.f32.xlu1 %v1104_v58  ;;  %v1048_v60 = vld [vmem:[#allocation2 + $0x2f] sm:$0xff]  ;;  %v1095_v8 = vmul.f32 %v1094_v47, %v1085_v1 }
 0x21f   :  { %v1061_v61 = vsel %vm29_vm0, %v1055_v59, 0.0  ;;  %v1058_v23 = vmul.f32 %v1054_v51, %v1048_v60  ;;  %v1064_v6 = vsel %vm29_vm0, %v1056_v62, 0.0  ;;  %v1125_v9 = vld [vmem:[#allocation2 + $0x9] sm:$0xff] }
 0x220   :  { %1062 = vadd.xlane.f32.xlu0 %v1061_v61  ;;  %v1126_v0 = vld [vmem:[#allocation2 + $0x11] sm:$0xff]  ;;  %v1101_v13 = vsel %vm29_vm0, %v1095_v8, 0.0  ;;  %v1135_v14 = vmul.f32 %v1134_v63, %v1125_v9  ;;  %v1127_v35 = vld [vmem:[#allocation2 + $0x19] sm:$0xff] }
 0x221   :  { %v1070_v2 = vsel %vm29_vm0, %v1058_v23, 0.0  ;;  %v1136_v3 = vmul.f32 %v1134_v63, %v1126_v0  ;;  %v1088_v15 = vld [vmem:[#allocation2 + $0x30] sm:$0xff]  ;;  %v1087_v29 = vld [vmem:[#allocation2 + $0x18] sm:$0xff]  ;;  %v1137_v40 = vmul.f32 %v1134_v63, %v1127_v35 }
 0x222   :  { %1071 = vadd.xlane.f32.xlu1 %v1070_v2  ;;  %v1090_v4 = vld [vmem:[#allocation2 + $0x40] sm:$0xff]  ;;  %v1141_v20 = vsel %vm29_vm0, %v1135_v14, 0.0  ;;  %v1098_v21 = vmul.f32 %v1094_v47, %v1088_v15  ;;  %v1047_v22 = vld [vmem:[#allocation2 + $0x17] sm:$0xff]  ;;  %v1097_v34 = vmul.f32 %v1094_v47, %v1087_v29 }
 0x223   :  { %v1144_v10 = vsel %vm29_vm0, %v1136_v3, 0.0  ;;  %v1100_v11 = vmul.f32 %v1094_v47, %v1090_v4  ;;  %v1057_v28 = vmul.f32 %v1054_v51, %v1047_v22  ;;  %v1130_v38 = vld [vmem:[#allocation2 + $0x41] sm:$0xff]  ;;  %v1147_v44 = vsel %vm29_vm0, %v1137_v40, 0.0 }
 0x224   :  { %1065 = vadd.xlane.f32.xlu0 %v1064_v6  ;;  %v1049_v12 = vld [vmem:[#allocation2 + $0x37] sm:$0xff]  ;;  %v1050_v19 = vld [vmem:[#allocation2 + $0x3f] sm:$0xff]  ;;  %v1110_v27 = vsel %vm29_vm0, %v1098_v21, 0.0  ;;  %v1107_v39 = vsel %vm29_vm0, %v1097_v34, 0.0  ;;  %v1140_v43 = vmul.f32 %v1134_v63, %v1130_v38 }
 0x225   :  { %v1116_v17 = vsel %vm29_vm0, %v1100_v11, 0.0  ;;  %v1059_v18 = vmul.f32 %v1054_v51, %v1049_v12  ;;  %v1060_v25 = vmul.f32 %v1054_v51, %v1050_v19  ;;  %v1089_v26 = vld [vmem:[#allocation2 + $0x38] sm:$0xff]  ;;  %v1067_v33 = vsel %vm29_vm0, %v1057_v28, 0.0 }
 0x226   :  { %1145 = vadd.xlane.f32.xlu1 %v1144_v10  ;;  %v1099_v31 = vmul.f32 %v1094_v47, %v1089_v26  ;;  %v1129_v32 = vld [vmem:[#allocation2 + $0x39] sm:$0xff]  ;;  %v1128_v41 = vld [vmem:[#allocation2 + $0x31] sm:$0xff]  ;;  %v1156_v46 = vsel %vm29_vm0, %v1140_v43, 0.0 }
 0x227   :  { %v1073_v24 = vsel %vm29_vm0, %v1059_v18, 0.0  ;;  %v1076_v30 = vsel %vm29_vm0, %v1060_v25, 0.0  ;;  %v1139_v37 = vmul.f32 %v1134_v63, %v1129_v32  ;;  %v1138_v45 = vmul.f32 %v1134_v63, %v1128_v41 }
 0x228   :  { %1102 = vadd.xlane.f32.xlu0 %v1101_v13  ;;  %v1113_v36 = vsel %vm29_vm0, %v1099_v31, 0.0 }
 0x229   :  { %v1153_v42 = vsel %vm29_vm0, %v1139_v37, 0.0  ;;  %v1150_v47 = vsel %vm29_vm0, %v1138_v45, 0.0 }
 0x22a   :  { %1117 = vadd.xlane.f32.xlu1 %v1116_v17 }
 0x22c   :  { %1142 = vadd.xlane.f32.xlu0 %v1141_v20 }
 0x22e   :  { %1074 = vadd.xlane.f32.xlu1 %v1073_v24 }
 0x230   :  { %1111 = vadd.xlane.f32.xlu0 %v1110_v27 }
 0x232   :  { %1077 = vadd.xlane.f32.xlu1 %v1076_v30 }
 0x234   :  { %1068 = vadd.xlane.f32.xlu0 %v1067_v33 }
 0x236   :  { %1114 = vadd.xlane.f32.xlu1 %v1113_v36 }
 0x238   :  { %1108 = vadd.xlane.f32.xlu0 %v1107_v39 }
 0x23a   :  { %1154 = vadd.xlane.f32.xlu1 %v1153_v42 }
 0x23c   :  { %1148 = vadd.xlane.f32.xlu0 %v1147_v44 }
 0x23e   :  { %1157 = vadd.xlane.f32.xlu1 %v1156_v46 }
 0x240   :  { %1151 = vadd.xlane.f32.xlu0 %v1150_v47 }
 0x24f   :  { %1216 = vbcast.lane.b32.xlu1 %v1313_v49, 256 }
 0x253   :  { %1220 = vbcast.lane.b32.xlu1 %v1313_v49, 264 }
 0x256   :  { %1041 = vperm.xlu0 %1649, %v1312_v50  }
 0x257   :  { %1224 = vbcast.lane.b32.xlu1 %v1313_v49, 272 }
 0x2a7   :  { %v1106_v51 = vpop.xlane.xlu1 %1105 }
 0x2a9   :  { %v1063_v52 = vpop.xlane.xlu0 %1062 }
 0x2ab   :  { %v1072_v53 = vpop.xlane.xlu1 %1071 }
 0x2ad   :  { %v1066_v54 = vpop.xlane.xlu0 %1065 }
 0x2af   :  { %v1146_v56 = vpop.xlane.xlu1 %1145 }
 0x2b1   :  { %v1103_v55 = vpop.xlane.xlu0 %1102 }
 0x2b3   :  { %v1118_v57 = vpop.xlane.xlu1 %1117 }
 0x2b5   :  { %v1143_v5 = vpop.xlane.xlu0 %1142 }
 0x2b7   :  { %v1075_v60 = vpop.xlane.xlu1 %1074 }
 0x2b9   :  { %v1112_v58 = vpop.xlane.xlu0 %1111 }
 0x2bb   :  { %v1078_v23 = vpop.xlane.xlu1 %1077 }
 0x2bd   :  { %v1069_v59 = vpop.xlane.xlu0 %1068 }
 0x2bf   :  { %v1115_v7 = vpop.xlane.xlu1 %1114 }
 0x2c1   :  { %v1109_v61 = vpop.xlane.xlu0 %1108 }
 0x2c3   :  { %v1155_v0 = vpop.xlane.xlu1 %1154 }
 0x2c5   :  { %v1149_v62 = vpop.xlane.xlu0 %1148 }
 0x2c7   :  { %v1158_v15 = vpop.xlane.xlu1 %1157 }
 0x2c9   :  { %v1152_v63 = vpop.xlane.xlu0 %1151 }
 0x2cb   :  { %v1217_v42 = vpop.permute.xlu1 %1216 }
 0x2cf   :  { %v1221_v44 = vpop.permute.xlu1 %1220 }
 0x2d1   :  { %v1042_v1 = vpop.permute.xlu0 %1041 }
 0x2d2   :  { %v1079_v2 = vadd.f32 %v1063_v52, %v1042_v1  ;;  %v1080_v3 = vadd.f32 %v1066_v54, %v1042_v1  ;;  %v1081_v4 = vadd.f32 %v1069_v59, %v1042_v1  ;;  %v1082_v6 = vadd.f32 %v1072_v53, %v1042_v1 }
 0x2d3   :  { %v1083_v8 = vadd.f32 %v1075_v60, %v1042_v1  ;;  %v1084_v9 = vadd.f32 %v1078_v23, %v1042_v1  ;;  %v1225_v53 = vpop.permute.xlu1 %1224 }
 0x2d4   :  { %v1119_v10 = vadd.f32 %v1103_v55, %v1079_v2  ;;  %v1120_v11 = vadd.f32 %v1106_v51, %v1080_v3  ;;  %v1122_v12 = vadd.f32 %v1112_v58, %v1082_v6  ;;  %v1121_v17 = vadd.f32 %v1109_v61, %v1081_v4 }
 0x2d5   :  { %v1123_v13 = vadd.f32 %v1115_v7, %v1083_v8  ;;  %v1124_v14 = vadd.f32 %v1118_v57, %v1084_v9  ;;  %v1270_v2 = vadd.s32 4294967280, %v2405_v48  ;;  %v1261_v4 = vsub.s32 %v2405_v48, %v2372_v16 }
 0x2d6   :  { %v1159_v18 = vadd.f32 %v1143_v5, %v1119_v10  ;;  %v1162_v19 = vadd.f32 %v1152_v63, %v1122_v12  ;;  %v1160_v20 = vadd.f32 %v1146_v56, %v1120_v11  ;;  %v1161_v28 = vadd.f32 %v1149_v62, %v1121_v17 }
 0x2d7   :  { %v1163_v21 = vadd.f32 %v1155_v0, %v1123_v13  ;;  %v1164_v22 = vadd.f32 %v1158_v15, %v1124_v14  ;;  %v1263_v0 = vadd.s32 4294967288, %v2405_v48  ;;  %v1273_v8 = vsub.s32 %v1270_v2, %v2372_v16 }
 0x2d8   :  { %v1314_v24 = vmul.f32 -1.442695, %v1159_v18  ;;  %v1317_v25 = vmul.f32 -1.442695, %v1162_v19  ;;  %v1315_v26 = vmul.f32 -1.442695, %v1160_v20 }
 0x2d9   :  { %v1318_v27 = vmul.f32 -1.442695, %v1163_v21  ;;  %v1319_v29 = vmul.f32 -1.442695, %v1164_v22  ;;  %v1316_v30 = vmul.f32 -1.442695, %v1161_v28  ;;  %v1266_v3 = vsub.s32 %v1263_v0, %v2372_v16 }
 0x2da   :  { %1651 = vpow2.f32 %v1314_v24 }
 0x2db   :  { %1653 = vpow2.f32 %v1317_v25 }
 0x2dc   :  { %1655 = vpow2.f32 %v1315_v26 }
 0x2dd   :  { %1657 = vpow2.f32 %v1318_v27 }
 0x2de   :  { %1659 = vpow2.f32 %v1319_v29 }
 0x2df   :  { %1661 = vpow2.f32 %v1316_v30 }
 0x2e7   :  { %v1652_v31 = vpop.eup %1651 }
 0x2e8   :  { %v1654_v32 = vpop.eup %1653  ;;  %v1190_v33 = vadd.f32 1.0, %v1652_v31 }
 0x2e9   :  { %v1656_v34 = vpop.eup %1655  ;;  %v1193_v35 = vadd.f32 1.0, %v1654_v32 }
 0x2ea   :  { %1663 = vrcp.f32 %v1190_v33  ;;  %v1191_v36 = vadd.f32 1.0, %v1656_v34  ;;  %v1658_v37 = vpop.eup %1657 }
 0x2eb   :  { %v1660_v38 = vpop.eup %1659  ;;  %v1194_v40 = vadd.f32 1.0, %v1658_v37 }
 0x2ec   :  { %1665 = vrcp.f32 %v1191_v36  ;;  %v1195_v39 = vadd.f32 1.0, %v1660_v38  ;;  %v1662_v41 = vpop.eup %1661 }
 0x2ed   :  { %1667 = vrcp.f32 %v1193_v35  ;;  %v1192_v43 = vadd.f32 1.0, %v1662_v41 }
 0x2ee   :  { %1669 = vrcp.f32 %v1195_v39 }
 0x2ef   :  { %1671 = vrcp.f32 %v1194_v40 }
 0x2f0   :  { %1673 = vrcp.f32 %v1192_v43 }
 0x2f7   :  { %v1664_v45 = vpop.eup %1663 }
 0x2f8   :  { %v1208_v46 = vmul.f32 5.0, %v1664_v45 }
 0x2f9   :  { %v1666_v47 = vpop.eup %1665 }
 0x2fa   :  { %v1229_v49 = vmul.f32 %v1217_v42, %v1208_v46  ;;  %v1209_v50 = vmul.f32 5.0, %v1666_v47  ;;  %v1668_v51 = vpop.eup %1667 }
 0x2fb   :  { %v1670_v52 = vpop.eup %1669  ;;  %v1211_v55 = vmul.f32 5.0, %v1668_v51 }
 0x2fc   :  { %1242 = vperm.xlu1 %1650, %v1229_v49   ;;  %v1213_v54 = vmul.f32 5.0, %v1670_v52  ;;  %v1230_v56 = vmul.f32 %v1221_v44, %v1209_v50  ;;  %v1672_v5 = vpop.eup %1671 }
 0x2fd   :  { %v1232_v58 = vmul.f32 %v1217_v42, %v1211_v55  ;;  %v1212_v59 = vmul.f32 5.0, %v1672_v5  ;;  %v1674_v60 = vpop.eup %1673 }
 0x2fe   :  { %v1234_v57 = vmul.f32 %v1225_v53, %v1213_v54  ;;  %v1210_v23 = vmul.f32 5.0, %v1674_v60 }
 0x2ff   :  { %v1233_v61 = vmul.f32 %v1221_v44, %v1212_v59 }
 0x300   :  { %1245 = vperm.xlu1 %1650, %v1230_v56   ;;  %1257 = vperm.xlu0 %1649, %v1234_v57   ;;  %v1231_v62 = vmul.f32 %v1225_v53, %v1210_v23 }
 0x304   :  { %1251 = vperm.xlu1 %1650, %v1232_v58  }
 0x308   :  { %1254 = vperm.xlu1 %1650, %v1233_v61  }
 0x30c   :  { %1248 = vperm.xlu1 %1650, %v1231_v62  }
 0x377   :  { %v1243_v7 = vpop.permute.xlu1 %1242 }
 0x378   :  { %v1262_v13 = vrot.slane %v1243_v7, %v1261_v4 }
 0x37b   :  { %v1246_v63 = vpop.permute.xlu1 %1245  ;;  %v1258_v10 = vpop.permute.xlu0 %1257 }
 0x37c   :  { %v1267_v11 = vrot.slane %v1246_v63, %v1266_v3  ;;  %v1289_v17 = vrot.slane %v1258_v10, %v1273_v8 }
 0x37e   :  { %v1269_v19 = vsel %vm1268_vm6, %v1267_v11, %v1262_v13 }
 0x37f   :  { %v1252_v1 = vpop.permute.xlu1 %1251 }
 0x380   :  { %v1280_v12 = vrot.slane %v1252_v1, %v1261_v4 }
 0x383   :  { %v1255_v6 = vpop.permute.xlu1 %1254 }
 0x384   :  { %v1284_v9 = vrot.slane %v1255_v6, %v1266_v3 }
 0x386   :  { %v1285_v14 = vsel %vm1268_vm6, %v1284_v9, %v1280_v12 }
 0x387   :  { %v1249_v15 = vpop.permute.xlu1 %1248  ;;  %v1290_v20 = vsel %vm1275_vm7, %v1289_v17, %v1285_v14 }
 0x388   :  { %v1274_v18 = vrot.slane %v1249_v15, %v1273_v8 }
 0x38a   :  { %v1276_v48 = vsel %vm1275_vm7, %v1274_v18, %v1269_v19 }
 0x38b   :  { %v1292_v16 = vsel %vm1291_vm8, %v1290_v20, %v1276_v48 }
 0x38c   :  { %1295 = vst.msk [vmem:[#allocation5] sm:$0x3] %vm1294_vm9, %v1292_v16 }
 0x38d   :  { %1686 = shalt.err (!%p1683_p4)
}
 0x38e   :  { %1305 = dma.vmem_to_hbm [thread:$0]  %s1303_s10, 32, %s2426_s7, [#allocation6]  }
 0x38f   :  { %1695 = dma.done.wait [#allocation6], 32  }
 0x390   :  { %1696 = vsyncadd [#allocation6], 4294967264 }
 0x391   :  { %1309 = vsyncpa [#allocation6], 1 }

</bundles_post_ra>
